<compile_context>
chip_gen: v7x
topology: tpu7x:2x2x1
jax: 0.10.0
libtpu: 0.0.40
codegen_flags: <defaults>
</compile_context>

<pallas_src>
import functools

import jax
import jax.numpy as jnp
from jax.experimental import pallas as pl
from jax.experimental.pallas import tpu as pltpu  # noqa: F401  (TPU backend)

# ----------------------- config (small, deterministic) -----------------------
BSZ = 2          # batch
NB_NODES = 16    # nodes in the graph
K = 6            # idx.shape[1] (remaining nodes fed to the encoder)
SEQ = K + 2      # + last_visited + first_visited
DIN = 2          # dim_input_nodes (2-D city coordinates)
DEMB = 32        # dim_emb
DFF = 64         # dim_ff
NLAYERS = 2      # nb_layers_encoder
NHEADS = 4       # nb_heads
DHEAD = DEMB // NHEADS
BN_EPS = 1e-5    # BatchNorm1d eps (training-mode batch statistics)


# ============================ fused Pallas kernel ============================

def fused_state_encoder_kernel(
        x_ref,                                             # (B, S, Din) raw node group
        wr_ref, br_ref, wl_ref, bl_ref, wf_ref, bf_ref,    # input embeddings
        wqkv_ref, bqkv_ref, wo_ref, bo_ref,                # MHA (QKV packed)
        w1_ref, b1_ref, w2_ref, b2_ref,                    # feed forward
        g1_ref, be1_ref, g2_ref, be2_ref,                  # batchnorm affine
        o_ref,                                             # (B*S, D) output
        *, k, nlayers, nheads, dhead):
    x = x_ref[...].astype(jnp.float32)                     # (B, S, Din)
    B, S, _ = x.shape
    D = wo_ref.shape[-1]
    N = B * S

    # ---- Normalization_layer --------------------------------------------------
    # TODO(synk): Normalization_layer source not provided; implemented as
    # per-batch min-max scaling (same assumption as the reference below).
    stats = x[:, :k + 2, :]
    lo = jnp.min(stats, axis=1, keepdims=True)
    hi = jnp.max(stats, axis=1, keepdims=True)
    xs = (x - lo) / (hi - lo + 1e-10)                      # (B, S, Din)

    # ---- Input embeddings ------------------------------------------------------
    # "remaining" projection for all rows (one flat matmul); last/first rows
    # get their own tiny single-row projections and overwrite rows k / k+1.
    xs2 = xs.reshape(N, xs.shape[-1])                      # (B*S, Din)
    er = jnp.dot(xs2, wr_ref[...],
                 preferred_element_type=jnp.float32) + br_ref[...]
    er3 = er.reshape(B, S, D)
    el = jnp.einsum('bsd,de->bse', xs[:, k:k + 1, :], wl_ref[...],
                    preferred_element_type=jnp.float32) + bl_ref[...]   # (B,1,D)
    ef = jnp.einsum('bsd,de->bse', xs[:, k + 1:k + 2, :], wf_ref[...],
                    preferred_element_type=jnp.float32) + bf_ref[...]   # (B,1,D)
    row = jax.lax.broadcasted_iota(jnp.int32, (B, S, D), 1)
    h3 = jnp.where(row == k, el, jnp.where(row == k + 1, ef, er3))
    h = h3.reshape(N, D)                                   # flat (B*S, D) carry

    scale = 1.0 / (float(dhead) ** 0.5)

    def batchnorm(y, g, b):
        # BatchNorm1d training mode: stats over (batch*seq) per channel.
        mean = jnp.mean(y, axis=0, keepdims=True)
        var = jnp.mean((y - mean) ** 2, axis=0, keepdims=True)
        return (y - mean) * jax.lax.rsqrt(var + BN_EPS) * g + b

    # ---- Transformer encoder layers (statically unrolled) ---------------------
    # TODO(synk): MultiHeadAttention class source not provided; assumed standard
    # scaled-dot-product MHA with Wq/Wk/Wv/Wo projections (biases included).
    for l in range(nlayers):
        # Fused QKV projection: one (N, D) @ (D, 3D) matmul.
        qkv = jnp.dot(h, wqkv_ref[l],
                      preferred_element_type=jnp.float32) + bqkv_ref[l]  # (N, 3D)
        q = qkv[:, 0:D].reshape(B, S, D)
        kk = qkv[:, D:2 * D].reshape(B, S, D)
        v = qkv[:, 2 * D:3 * D].reshape(B, S, D)

        # Fold heads into the batch axis -> one batched contraction each for
        # scores and PV instead of a per-head loop.
        qh = jnp.concatenate(
            [q[:, :, i * dhead:(i + 1) * dhead] for i in range(nheads)], axis=0)
        kh = jnp.concatenate(
            [kk[:, :, i * dhead:(i + 1) * dhead] for i in range(nheads)], axis=0)
        vh = jnp.concatenate(
            [v[:, :, i * dhead:(i + 1) * dhead] for i in range(nheads)], axis=0)

        s = jnp.einsum('bqd,bkd->bqk', qh, kh,
                       preferred_element_type=jnp.float32) * scale       # (H*B,S,S)
        s = s - jnp.max(s, axis=-1, keepdims=True)
        p = jnp.exp(s)
        denom = jnp.sum(p, axis=-1, keepdims=True)
        r = pl.reciprocal(denom, approx=True)
        r = r * (2.0 - denom * r)          # one Newton step -> ~exact f32 recip
        p = p * r
        oh = jnp.einsum('bqk,bkd->bqd', p, vh,
                        preferred_element_type=jnp.float32)              # (H*B,S,dh)
        attn = jnp.concatenate(
            [oh[i * B:(i + 1) * B] for i in range(nheads)], axis=-1)     # (B,S,D)

        mha = jnp.dot(attn.reshape(N, D), wo_ref[l],
                      preferred_element_type=jnp.float32) + bo_ref[l]
        h = batchnorm(h + mha, g1_ref[l], be1_ref[l])

        f = jnp.dot(h, w1_ref[l], preferred_element_type=jnp.float32) + b1_ref[l]
        f = jnp.maximum(f, 0.0)
        f = jnp.dot(f, w2_ref[l], preferred_element_type=jnp.float32) + b2_ref[l]
        h = batchnorm(h + f, g2_ref[l], be2_ref[l])

    o_ref[...] = h.astype(o_ref.dtype)


# ============================ wrapper ========================================

@jax.jit
def state_encoder_tsp_forward(graph, idx, last_visited_node, first_visited_node,
                              params):
    bsz, k = idx.shape
    # Data-dependent gather (graph[b_k, idx] in PyTorch) has no clean in-kernel
    # Pallas equivalent at this scale; done with take_along_axis outside.
    node_group = jnp.take_along_axis(
        graph, idx[:, :, None].astype(jnp.int32), axis=1)               # (B,K,Din)
    node_group = jnp.concatenate(
        [node_group, last_visited_node, first_visited_node], axis=1)    # (B,K+2,Din)

    B, S, _ = node_group.shape
    D = params['w_remain'].shape[1]

    # Pack Wq|Wk|Wv into one slab per layer (done outside, folded by XLA).
    wqkv = jnp.concatenate([params['wq'], params['wk'], params['wv']], axis=-1)
    bqkv = jnp.concatenate([params['bq'], params['bk'], params['bv']], axis=-1)

    out_flat = pl.pallas_call(
        functools.partial(fused_state_encoder_kernel,
                          k=k, nlayers=NLAYERS, nheads=NHEADS, dhead=DHEAD),
        out_shape=jax.ShapeDtypeStruct((B * S, D), jnp.float32),
    )(node_group,
      params['w_remain'], params['b_remain'].reshape(1, D),
      params['w_last'], params['b_last'].reshape(1, D),
      params['w_first'], params['b_first'].reshape(1, D),
      wqkv, bqkv,
      params['wo'], params['bo'],
      params['w1'], params['b1'],
      params['w2'], params['b2'],
      params['g1'], params['beta1'], params['g2'], params['beta2'])
    return out_flat.reshape(B, S, D)


# ============================ pure-JAX reference =============================

def normalization_layer(node_group, k):
    # TODO(synk): Normalization_layer source not provided; min-max scaling.
    stats = node_group[:, :k + 1, :]
    lo = jnp.min(stats, axis=1, keepdims=True)
    hi = jnp.max(stats, axis=1, keepdims=True)
    return (node_group - lo) / (hi - lo + 1e-10)


def reference_forward(graph, idx, last_visited_node, first_visited_node, params):
    bsz, k = idx.shape
    node_group = jnp.take_along_axis(graph, idx[:, :, None].astype(jnp.int32), axis=1)
    node_group = jnp.concatenate([node_group, last_visited_node, first_visited_node],
                                 axis=1)
    x = normalization_layer(node_group, k + 1)

    er = x @ params['w_remain'] + params['b_remain']
    el = x @ params['w_last'] + params['b_last']
    ef = x @ params['w_first'] + params['b_first']
    row = jnp.arange(x.shape[1])[None, :, None]
    h = jnp.where(row == k, el, jnp.where(row == k + 1, ef, er))

    B, S, D = h.shape

    def bn(y, g, b):
        mean = jnp.mean(y, axis=(0, 1), keepdims=True)
        var = jnp.mean((y - mean) ** 2, axis=(0, 1), keepdims=True)
        return (y - mean) * jax.lax.rsqrt(var + BN_EPS) * g + b

    for l in range(NLAYERS):
        q = h @ params['wq'][l] + params['bq'][l]
        kk = h @ params['wk'][l] + params['bk'][l]
        v = h @ params['wv'][l] + params['bv'][l]
        split = lambda t: t.reshape(B, S, NHEADS, DHEAD)
        s = jnp.einsum('bqhd,bkhd->bhqk', split(q), split(kk)) / jnp.sqrt(1.0 * DHEAD)
        a = jax.nn.softmax(s, axis=-1)
        attn = jnp.einsum('bhqk,bkhd->bqhd', a, split(v)).reshape(B, S, D)
        mha = attn @ params['wo'][l] + params['bo'][l]
        h = bn(h + mha, params['g1'][l], params['beta1'][l])
        f = jax.nn.relu(h @ params['w1'][l] + params['b1'][l])
        f = f @ params['w2'][l] + params['b2'][l]
        h = bn(h + f, params['g2'][l], params['beta2'][l])
    return h


# ============================ params & main ==================================

def init_params(key):
    def linear(key, fan_in, fan_out):
        kw, kb = jax.random.split(key)
        bound = 1.0 / jnp.sqrt(fan_in)
        w = jax.random.uniform(kw, (fan_in, fan_out), jnp.float32, -bound, bound)
        b = jax.random.uniform(kb, (fan_out,), jnp.float32, -bound, bound)
        return w, b

    keys = jax.random.split(key, 3 + NLAYERS * 6)
    p = {}
    p['w_remain'], p['b_remain'] = linear(keys[0], DIN, DEMB)
    p['w_last'], p['b_last'] = linear(keys[1], DIN, DEMB)
    p['w_first'], p['b_first'] = linear(keys[2], DIN, DEMB)

    def stack(fn):
        ws, bs = zip(*fn)
        return jnp.stack(ws), jnp.stack(bs)[:, None, :]   # biases -> (L,1,dim)

    kidx = 3
    p['wq'], p['bq'] = stack([linear(keys[kidx + l], DEMB, DEMB) for l in range(NLAYERS)]); kidx += NLAYERS
    p['wk'], p['bk'] = stack([linear(keys[kidx + l], DEMB, DEMB) for l in range(NLAYERS)]); kidx += NLAYERS
    p['wv'], p['bv'] = stack([linear(keys[kidx + l], DEMB, DEMB) for l in range(NLAYERS)]); kidx += NLAYERS
    p['wo'], p['bo'] = stack([linear(keys[kidx + l], DEMB, DEMB) for l in range(NLAYERS)]); kidx += NLAYERS
    p['w1'], p['b1'] = stack([linear(keys[kidx + l], DEMB, DFF) for l in range(NLAYERS)]); kidx += NLAYERS
    p['w2'], p['b2'] = stack([linear(keys[kidx + l], DFF, DEMB) for l in range(NLAYERS)]); kidx += NLAYERS
    # BatchNorm1d affine params (gamma=1, beta=0), shaped (L,1,D)
    p['g1'] = jnp.ones((NLAYERS, 1, DEMB), jnp.float32)
    p['beta1'] = jnp.zeros((NLAYERS, 1, DEMB), jnp.float32)
    p['g2'] = jnp.ones((NLAYERS, 1, DEMB), jnp.float32)
    p['beta2'] = jnp.zeros((NLAYERS, 1, DEMB), jnp.float32)
    return p


if __name__ == "__main__":
    key = jax.random.PRNGKey(0)
    kp, kg, ki, kl, kf = jax.random.split(key, 5)

    params = init_params(kp)
    graph = jax.random.normal(kg, (BSZ, NB_NODES, DIN), jnp.float32)
    idx = jax.random.randint(ki, (BSZ, K), 0, NB_NODES, jnp.int32)
    last_visited_node = jax.random.normal(kl, (BSZ, 1, DIN), jnp.float32)
    first_visited_node = jax.random.normal(kf, (BSZ, 1, DIN), jnp.float32)

    out = state_encoder_tsp_forward(graph, idx, last_visited_node,
                                    first_visited_node, params)
    out = jax.block_until_ready(out)

    ref = reference_forward(graph, idx, last_visited_node,
                            first_visited_node, params)
    assert out.shape == (BSZ, SEQ, DEMB)
    # 5e-4 tolerance: identical math / contraction order, tiny divergence from
    # the EUP reciprocal (+Newton step) and in-kernel reduction ordering.
    assert jnp.allclose(out, ref, rtol=5e-4, atol=5e-4), \
        f"max abs err {jnp.max(jnp.abs(out - ref))}"
    print("KERNEL_OK")
</pallas_src>

<mosaic_0001>
module attributes {stable_mosaic.version = 11 : i64} {
  func.func @fused_state_encoder_kernel(%arg0: memref<2x8x2xf32, #tpu.memory_space<vmem>>, %arg1: memref<2x32xf32, #tpu.memory_space<vmem>>, %arg2: memref<1x32xf32, #tpu.memory_space<vmem>>, %arg3: memref<2x32xf32, #tpu.memory_space<vmem>>, %arg4: memref<1x32xf32, #tpu.memory_space<vmem>>, %arg5: memref<2x32xf32, #tpu.memory_space<vmem>>, %arg6: memref<1x32xf32, #tpu.memory_space<vmem>>, %arg7: memref<2x32x96xf32, #tpu.memory_space<vmem>>, %arg8: memref<2x1x96xf32, #tpu.memory_space<vmem>>, %arg9: memref<2x32x32xf32, #tpu.memory_space<vmem>>, %arg10: memref<2x1x32xf32, #tpu.memory_space<vmem>>, %arg11: memref<2x32x64xf32, #tpu.memory_space<vmem>>, %arg12: memref<2x1x64xf32, #tpu.memory_space<vmem>>, %arg13: memref<2x64x32xf32, #tpu.memory_space<vmem>>, %arg14: memref<2x1x32xf32, #tpu.memory_space<vmem>>, %arg15: memref<2x1x32xf32, #tpu.memory_space<vmem>>, %arg16: memref<2x1x32xf32, #tpu.memory_space<vmem>>, %arg17: memref<2x1x32xf32, #tpu.memory_space<vmem>>, %arg18: memref<2x1x32xf32, #tpu.memory_space<vmem>>, %arg19: memref<16x32xf32, #tpu.memory_space<vmem>>) attributes {dimension_semantics = [], scalar_prefetch = 0 : i64, scratch_operands = 0 : i64, tpu.core_type = #tpu.core_type<tc>} {
    %c0 = arith.constant 0 : index
    %c0_0 = arith.constant 0 : index
    %c0_1 = arith.constant 0 : index
    %0 = vector.load %arg0[%c0, %c0_0, %c0_1] : memref<2x8x2xf32, #tpu.memory_space<vmem>>, vector<2x8x2xf32>
    %cst = arith.constant dense<0x7F800000> : vector<2x2xf32>
    %1 = vector.multi_reduction <minimumf>, %0, %cst [1] : vector<2x8x2xf32> to vector<2x2xf32>
    %2 = vector.shape_cast %1 : vector<2x2xf32> to vector<2x1x2xf32>
    %cst_2 = arith.constant dense<0xFF800000> : vector<2x2xf32>
    %3 = vector.multi_reduction <maximumf>, %0, %cst_2 [1] : vector<2x8x2xf32> to vector<2x2xf32>
    %4 = vector.shape_cast %3 : vector<2x2xf32> to vector<2x1x2xf32>
    %5 = vector.broadcast %2 : vector<2x1x2xf32> to vector<2x8x2xf32>
    %6 = arith.subf %0, %5 : vector<2x8x2xf32>
    %7 = arith.subf %4, %2 : vector<2x1x2xf32>
    %cst_3 = arith.constant 1.000000e-10 : f32
    %8 = vector.broadcast %cst_3 : f32 to vector<2x1x2xf32>
    %9 = arith.addf %7, %8 : vector<2x1x2xf32>
    %10 = vector.broadcast %9 : vector<2x1x2xf32> to vector<2x8x2xf32>
    %11 = arith.divf %6, %10 : vector<2x8x2xf32>
    %12 = vector.shape_cast %11 : vector<2x8x2xf32> to vector<16x2xf32>
    %c0_4 = arith.constant 0 : index
    %c0_5 = arith.constant 0 : index
    %13 = vector.load %arg1[%c0_4, %c0_5] : memref<2x32xf32, #tpu.memory_space<vmem>>, vector<2x32xf32>
    %cst_6 = arith.constant dense<0.000000e+00> : vector<16x32xf32>
    %14 = tpu.matmul %12, %13, %cst_6 {dimension_numbers = #tpu.dot_dimension_numbers<[1], [0], [0], [1], [0, 0, 1, 1], [], []>} : vector<16x2xf32>, vector<2x32xf32>, vector<16x32xf32> -> vector<16x32xf32>
    %c0_7 = arith.constant 0 : index
    %c0_8 = arith.constant 0 : index
    %15 = vector.load %arg2[%c0_7, %c0_8] : memref<1x32xf32, #tpu.memory_space<vmem>>, vector<1x32xf32>
    %16 = vector.broadcast %15 : vector<1x32xf32> to vector<16x32xf32>
    %17 = arith.addf %14, %16 : vector<16x32xf32>
    %18 = vector.shape_cast %17 : vector<16x32xf32> to vector<2x8x32xf32>
    %19 = vector.extract_strided_slice %11 {offsets = [0, 6, 0], sizes = [2, 1, 2], strides = [1, 1, 1]} : vector<2x8x2xf32> to vector<2x1x2xf32>
    %c0_9 = arith.constant 0 : index
    %c0_10 = arith.constant 0 : index
    %20 = vector.load %arg3[%c0_9, %c0_10] : memref<2x32xf32, #tpu.memory_space<vmem>>, vector<2x32xf32>
    "tpu.trace_start"() <{level = 10 : i32, message = "bsd,de->bse"}> : () -> ()
    %cst_11 = arith.constant dense<0.000000e+00> : vector<2x1x32xf32>
    %21 = tpu.matmul %19, %20, %cst_11 {dimension_numbers = #tpu.dot_dimension_numbers<[2], [0], [0, 1], [1], [0, 0, 0, 1, 1, 1], [], []>} : vector<2x1x2xf32>, vector<2x32xf32>, vector<2x1x32xf32> -> vector<2x1x32xf32>
    "tpu.trace_stop"() : () -> ()
    %c0_12 = arith.constant 0 : index
    %c0_13 = arith.constant 0 : index
    %22 = vector.load %arg4[%c0_12, %c0_13] : memref<1x32xf32, #tpu.memory_space<vmem>>, vector<1x32xf32>
    %23 = vector.shape_cast %22 : vector<1x32xf32> to vector<1x1x32xf32>
    %24 = vector.broadcast %23 : vector<1x1x32xf32> to vector<2x1x32xf32>
    %25 = arith.addf %21, %24 : vector<2x1x32xf32>
    %26 = vector.extract_strided_slice %11 {offsets = [0, 7, 0], sizes = [2, 1, 2], strides = [1, 1, 1]} : vector<2x8x2xf32> to vector<2x1x2xf32>
    %c0_14 = arith.constant 0 : index
    %c0_15 = arith.constant 0 : index
    %27 = vector.load %arg5[%c0_14, %c0_15] : memref<2x32xf32, #tpu.memory_space<vmem>>, vector<2x32xf32>
    "tpu.trace_start"() <{level = 10 : i32, message = "bsd,de->bse"}> : () -> ()
    %cst_16 = arith.constant dense<0.000000e+00> : vector<2x1x32xf32>
    %28 = tpu.matmul %26, %27, %cst_16 {dimension_numbers = #tpu.dot_dimension_numbers<[2], [0], [0, 1], [1], [0, 0, 0, 1, 1, 1], [], []>} : vector<2x1x2xf32>, vector<2x32xf32>, vector<2x1x32xf32> -> vector<2x1x32xf32>
    "tpu.trace_stop"() : () -> ()
    %c0_17 = arith.constant 0 : index
    %c0_18 = arith.constant 0 : index
    %29 = vector.load %arg6[%c0_17, %c0_18] : memref<1x32xf32, #tpu.memory_space<vmem>>, vector<1x32xf32>
    %30 = vector.shape_cast %29 : vector<1x32xf32> to vector<1x1x32xf32>
    %31 = vector.broadcast %30 : vector<1x1x32xf32> to vector<2x1x32xf32>
    %32 = arith.addf %28, %31 : vector<2x1x32xf32>
    %33 = tpu.iota {dimensions = array<i32: 1>} : vector<2x8x32xi32>
    %c6_i32 = arith.constant 6 : i32
    %34 = vector.broadcast %c6_i32 : i32 to vector<2x8x32xi32>
    %35 = arith.cmpi eq, %33, %34 : vector<2x8x32xi32>
    %c7_i32 = arith.constant 7 : i32
    %36 = vector.broadcast %c7_i32 : i32 to vector<2x8x32xi32>
    %37 = arith.cmpi eq, %33, %36 : vector<2x8x32xi32>
    %38 = vector.shape_cast %32 : vector<2x1x32xf32> to vector<2x1x32xf32>
    %39 = vector.broadcast %38 : vector<2x1x32xf32> to vector<2x8x32xf32>
    %40 = arith.select %37, %39, %18 : vector<2x8x32xi1>, vector<2x8x32xf32>
    %41 = vector.shape_cast %25 : vector<2x1x32xf32> to vector<2x1x32xf32>
    %42 = vector.broadcast %41 : vector<2x1x32xf32> to vector<2x8x32xf32>
    %43 = arith.select %35, %42, %40 : vector<2x8x32xi1>, vector<2x8x32xf32>
    %44 = vector.shape_cast %43 : vector<2x8x32xf32> to vector<16x32xf32>
    %c0_19 = arith.constant 0 : index
    %c0_20 = arith.constant 0 : index
    %c0_21 = arith.constant 0 : index
    %45 = vector.load %arg7[%c0_19, %c0_20, %c0_21] : memref<2x32x96xf32, #tpu.memory_space<vmem>>, vector<1x32x96xf32>
    %46 = vector.shape_cast %45 : vector<1x32x96xf32> to vector<32x96xf32>
    %cst_22 = arith.constant dense<0.000000e+00> : vector<16x96xf32>
    %47 = tpu.matmul %44, %46, %cst_22 {dimension_numbers = #tpu.dot_dimension_numbers<[1], [0], [0], [1], [0, 0, 1, 1], [], []>} : vector<16x32xf32>, vector<32x96xf32>, vector<16x96xf32> -> vector<16x96xf32>
    %c0_23 = arith.constant 0 : index
    %c0_24 = arith.constant 0 : index
    %c0_25 = arith.constant 0 : index
    %48 = vector.load %arg8[%c0_23, %c0_24, %c0_25] : memref<2x1x96xf32, #tpu.memory_space<vmem>>, vector<1x1x96xf32>
    %49 = vector.shape_cast %48 : vector<1x1x96xf32> to vector<1x96xf32>
    %50 = vector.broadcast %49 : vector<1x96xf32> to vector<16x96xf32>
    %51 = arith.addf %47, %50 : vector<16x96xf32>
    %52 = vector.extract_strided_slice %51 {offsets = [0, 0], sizes = [16, 32], strides = [1, 1]} : vector<16x96xf32> to vector<16x32xf32>
    %53 = vector.shape_cast %52 : vector<16x32xf32> to vector<2x8x32xf32>
    %54 = vector.extract_strided_slice %51 {offsets = [0, 32], sizes = [16, 32], strides = [1, 1]} : vector<16x96xf32> to vector<16x32xf32>
    %55 = vector.shape_cast %54 : vector<16x32xf32> to vector<2x8x32xf32>
    %56 = vector.extract_strided_slice %51 {offsets = [0, 64], sizes = [16, 32], strides = [1, 1]} : vector<16x96xf32> to vector<16x32xf32>
    %57 = vector.shape_cast %56 : vector<16x32xf32> to vector<2x8x32xf32>
    %58 = vector.extract_strided_slice %53 {offsets = [0, 0, 0], sizes = [2, 8, 8], strides = [1, 1, 1]} : vector<2x8x32xf32> to vector<2x8x8xf32>
    %59 = vector.extract_strided_slice %53 {offsets = [0, 0, 8], sizes = [2, 8, 8], strides = [1, 1, 1]} : vector<2x8x32xf32> to vector<2x8x8xf32>
    %60 = vector.extract_strided_slice %53 {offsets = [0, 0, 16], sizes = [2, 8, 8], strides = [1, 1, 1]} : vector<2x8x32xf32> to vector<2x8x8xf32>
    %61 = vector.extract_strided_slice %53 {offsets = [0, 0, 24], sizes = [2, 8, 8], strides = [1, 1, 1]} : vector<2x8x32xf32> to vector<2x8x8xf32>
    %62 = tpu.concatenate %58, %59, %60, %61 in 0 : vector<2x8x8xf32>, vector<2x8x8xf32>, vector<2x8x8xf32>, vector<2x8x8xf32> -> vector<8x8x8xf32>
    %63 = vector.extract_strided_slice %55 {offsets = [0, 0, 0], sizes = [2, 8, 8], strides = [1, 1, 1]} : vector<2x8x32xf32> to vector<2x8x8xf32>
    %64 = vector.extract_strided_slice %55 {offsets = [0, 0, 8], sizes = [2, 8, 8], strides = [1, 1, 1]} : vector<2x8x32xf32> to vector<2x8x8xf32>
    %65 = vector.extract_strided_slice %55 {offsets = [0, 0, 16], sizes = [2, 8, 8], strides = [1, 1, 1]} : vector<2x8x32xf32> to vector<2x8x8xf32>
    %66 = vector.extract_strided_slice %55 {offsets = [0, 0, 24], sizes = [2, 8, 8], strides = [1, 1, 1]} : vector<2x8x32xf32> to vector<2x8x8xf32>
    %67 = tpu.concatenate %63, %64, %65, %66 in 0 : vector<2x8x8xf32>, vector<2x8x8xf32>, vector<2x8x8xf32>, vector<2x8x8xf32> -> vector<8x8x8xf32>
    %68 = vector.extract_strided_slice %57 {offsets = [0, 0, 0], sizes = [2, 8, 8], strides = [1, 1, 1]} : vector<2x8x32xf32> to vector<2x8x8xf32>
    %69 = vector.extract_strided_slice %57 {offsets = [0, 0, 8], sizes = [2, 8, 8], strides = [1, 1, 1]} : vector<2x8x32xf32> to vector<2x8x8xf32>
    %70 = vector.extract_strided_slice %57 {offsets = [0, 0, 16], sizes = [2, 8, 8], strides = [1, 1, 1]} : vector<2x8x32xf32> to vector<2x8x8xf32>
    %71 = vector.extract_strided_slice %57 {offsets = [0, 0, 24], sizes = [2, 8, 8], strides = [1, 1, 1]} : vector<2x8x32xf32> to vector<2x8x8xf32>
    %72 = tpu.concatenate %68, %69, %70, %71 in 0 : vector<2x8x8xf32>, vector<2x8x8xf32>, vector<2x8x8xf32>, vector<2x8x8xf32> -> vector<8x8x8xf32>
    "tpu.trace_start"() <{level = 10 : i32, message = "bqd,bkd->bqk"}> : () -> ()
    %cst_26 = arith.constant dense<0.000000e+00> : vector<8x8x8xf32>
    %73 = tpu.matmul %62, %67, %cst_26 {dimension_numbers = #tpu.dot_dimension_numbers<[2], [2], [1], [1], [0, 0, 0, 1, 1, 1], [0], [0]>} : vector<8x8x8xf32>, vector<8x8x8xf32>, vector<8x8x8xf32> -> vector<8x8x8xf32>
    "tpu.trace_stop"() : () -> ()
    %cst_27 = arith.constant 0.353553385 : f32
    %74 = vector.broadcast %cst_27 : f32 to vector<8x8x8xf32>
    %75 = arith.mulf %73, %74 : vector<8x8x8xf32>
    %cst_28 = arith.constant dense<0xFF800000> : vector<8x8xf32>
    %76 = vector.multi_reduction <maximumf>, %75, %cst_28 [2] : vector<8x8x8xf32> to vector<8x8xf32>
    %77 = vector.shape_cast %76 : vector<8x8xf32> to vector<8x8x1xf32>
    %78 = vector.broadcast %77 : vector<8x8x1xf32> to vector<8x8x8xf32>
    %79 = arith.subf %75, %78 : vector<8x8x8xf32>
    %80 = math.exp %79 : vector<8x8x8xf32>
    %cst_29 = arith.constant dense<0.000000e+00> : vector<8x8xf32>
    %81 = vector.multi_reduction <add>, %80, %cst_29 [2] : vector<8x8x8xf32> to vector<8x8xf32>
    %82 = vector.shape_cast %81 : vector<8x8xf32> to vector<8x8x1xf32>
    %83 = tpu.reciprocal %82 {approx = true} : vector<8x8x1xf32> -> vector<8x8x1xf32>
    %84 = arith.mulf %82, %83 : vector<8x8x1xf32>
    %cst_30 = arith.constant 2.000000e+00 : f32
    %85 = vector.broadcast %cst_30 : f32 to vector<8x8x1xf32>
    %86 = arith.subf %85, %84 : vector<8x8x1xf32>
    %87 = arith.mulf %83, %86 : vector<8x8x1xf32>
    %88 = vector.broadcast %87 : vector<8x8x1xf32> to vector<8x8x8xf32>
    %89 = arith.mulf %80, %88 : vector<8x8x8xf32>
    "tpu.trace_start"() <{level = 10 : i32, message = "bqk,bkd->bqd"}> : () -> ()
    %cst_31 = arith.constant dense<0.000000e+00> : vector<8x8x8xf32>
    %90 = tpu.matmul %89, %72, %cst_31 {dimension_numbers = #tpu.dot_dimension_numbers<[2], [1], [1], [2], [0, 0, 0, 1, 1, 2], [0], [0]>} : vector<8x8x8xf32>, vector<8x8x8xf32>, vector<8x8x8xf32> -> vector<8x8x8xf32>
    "tpu.trace_stop"() : () -> ()
    %91 = vector.extract_strided_slice %90 {offsets = [0, 0, 0], sizes = [2, 8, 8], strides = [1, 1, 1]} : vector<8x8x8xf32> to vector<2x8x8xf32>
    %92 = vector.extract_strided_slice %90 {offsets = [2, 0, 0], sizes = [2, 8, 8], strides = [1, 1, 1]} : vector<8x8x8xf32> to vector<2x8x8xf32>
    %93 = vector.extract_strided_slice %90 {offsets = [4, 0, 0], sizes = [2, 8, 8], strides = [1, 1, 1]} : vector<8x8x8xf32> to vector<2x8x8xf32>
    %94 = vector.extract_strided_slice %90 {offsets = [6, 0, 0], sizes = [2, 8, 8], strides = [1, 1, 1]} : vector<8x8x8xf32> to vector<2x8x8xf32>
    %95 = tpu.concatenate %91, %92, %93, %94 in 2 : vector<2x8x8xf32>, vector<2x8x8xf32>, vector<2x8x8xf32>, vector<2x8x8xf32> -> vector<2x8x32xf32>
    %96 = vector.shape_cast %95 : vector<2x8x32xf32> to vector<16x32xf32>
    %c0_32 = arith.constant 0 : index
    %c0_33 = arith.constant 0 : index
    %c0_34 = arith.constant 0 : index
    %97 = vector.load %arg9[%c0_32, %c0_33, %c0_34] : memref<2x32x32xf32, #tpu.memory_space<vmem>>, vector<1x32x32xf32>
    %98 = vector.shape_cast %97 : vector<1x32x32xf32> to vector<32x32xf32>
    %cst_35 = arith.constant dense<0.000000e+00> : vector<16x32xf32>
    %99 = tpu.matmul %96, %98, %cst_35 {dimension_numbers = #tpu.dot_dimension_numbers<[1], [0], [0], [1], [0, 0, 1, 1], [], []>} : vector<16x32xf32>, vector<32x32xf32>, vector<16x32xf32> -> vector<16x32xf32>
    %c0_36 = arith.constant 0 : index
    %c0_37 = arith.constant 0 : index
    %c0_38 = arith.constant 0 : index
    %100 = vector.load %arg10[%c0_36, %c0_37, %c0_38] : memref<2x1x32xf32, #tpu.memory_space<vmem>>, vector<1x1x32xf32>
    %101 = vector.shape_cast %100 : vector<1x1x32xf32> to vector<1x32xf32>
    %102 = vector.broadcast %101 : vector<1x32xf32> to vector<16x32xf32>
    %103 = arith.addf %99, %102 : vector<16x32xf32>
    %104 = arith.addf %44, %103 : vector<16x32xf32>
    %c0_39 = arith.constant 0 : index
    %c0_40 = arith.constant 0 : index
    %c0_41 = arith.constant 0 : index
    %105 = vector.load %arg15[%c0_39, %c0_40, %c0_41] : memref<2x1x32xf32, #tpu.memory_space<vmem>>, vector<1x1x32xf32>
    %106 = vector.shape_cast %105 : vector<1x1x32xf32> to vector<1x32xf32>
    %c0_42 = arith.constant 0 : index
    %c0_43 = arith.constant 0 : index
    %c0_44 = arith.constant 0 : index
    %107 = vector.load %arg16[%c0_42, %c0_43, %c0_44] : memref<2x1x32xf32, #tpu.memory_space<vmem>>, vector<1x1x32xf32>
    %108 = vector.shape_cast %107 : vector<1x1x32xf32> to vector<1x32xf32>
    %cst_45 = arith.constant dense<0.000000e+00> : vector<32xf32>
    %109 = vector.multi_reduction <add>, %104, %cst_45 [0] : vector<16x32xf32> to vector<32xf32>
    %110 = vector.shape_cast %109 : vector<32xf32> to vector<1x32xf32>
    %cst_46 = arith.constant 1.600000e+01 : f32
    %111 = vector.broadcast %cst_46 : f32 to vector<1x32xf32>
    %112 = arith.divf %110, %111 : vector<1x32xf32>
    %113 = vector.broadcast %112 : vector<1x32xf32> to vector<16x32xf32>
    %114 = arith.subf %104, %113 : vector<16x32xf32>
    %115 = arith.mulf %114, %114 : vector<16x32xf32>
    %cst_47 = arith.constant dense<0.000000e+00> : vector<32xf32>
    %116 = vector.multi_reduction <add>, %115, %cst_47 [0] : vector<16x32xf32> to vector<32xf32>
    %117 = vector.shape_cast %116 : vector<32xf32> to vector<1x32xf32>
    %cst_48 = arith.constant 1.600000e+01 : f32
    %118 = vector.broadcast %cst_48 : f32 to vector<1x32xf32>
    %119 = arith.divf %117, %118 : vector<1x32xf32>
    %120 = vector.broadcast %112 : vector<1x32xf32> to vector<16x32xf32>
    %121 = arith.subf %104, %120 : vector<16x32xf32>
    %cst_49 = arith.constant 9.99999974E-6 : f32
    %122 = vector.broadcast %cst_49 : f32 to vector<1x32xf32>
    %123 = arith.addf %119, %122 : vector<1x32xf32>
    %124 = math.rsqrt %123 : vector<1x32xf32>
    %125 = vector.broadcast %124 : vector<1x32xf32> to vector<16x32xf32>
    %126 = arith.mulf %121, %125 : vector<16x32xf32>
    %127 = vector.broadcast %106 : vector<1x32xf32> to vector<16x32xf32>
    %128 = arith.mulf %126, %127 : vector<16x32xf32>
    %129 = vector.broadcast %108 : vector<1x32xf32> to vector<16x32xf32>
    %130 = arith.addf %128, %129 : vector<16x32xf32>
    %c0_50 = arith.constant 0 : index
    %c0_51 = arith.constant 0 : index
    %c0_52 = arith.constant 0 : index
    %131 = vector.load %arg11[%c0_50, %c0_51, %c0_52] : memref<2x32x64xf32, #tpu.memory_space<vmem>>, vector<1x32x64xf32>
    %132 = vector.shape_cast %131 : vector<1x32x64xf32> to vector<32x64xf32>
    %cst_53 = arith.constant dense<0.000000e+00> : vector<16x64xf32>
    %133 = tpu.matmul %130, %132, %cst_53 {dimension_numbers = #tpu.dot_dimension_numbers<[1], [0], [0], [1], [0, 0, 1, 1], [], []>} : vector<16x32xf32>, vector<32x64xf32>, vector<16x64xf32> -> vector<16x64xf32>
    %c0_54 = arith.constant 0 : index
    %c0_55 = arith.constant 0 : index
    %c0_56 = arith.constant 0 : index
    %134 = vector.load %arg12[%c0_54, %c0_55, %c0_56] : memref<2x1x64xf32, #tpu.memory_space<vmem>>, vector<1x1x64xf32>
    %135 = vector.shape_cast %134 : vector<1x1x64xf32> to vector<1x64xf32>
    %136 = vector.broadcast %135 : vector<1x64xf32> to vector<16x64xf32>
    %137 = arith.addf %133, %136 : vector<16x64xf32>
    %cst_57 = arith.constant 0.000000e+00 : f32
    %138 = vector.broadcast %cst_57 : f32 to vector<16x64xf32>
    %139 = arith.maximumf %137, %138 : vector<16x64xf32>
    %c0_58 = arith.constant 0 : index
    %c0_59 = arith.constant 0 : index
    %c0_60 = arith.constant 0 : index
    %140 = vector.load %arg13[%c0_58, %c0_59, %c0_60] : memref<2x64x32xf32, #tpu.memory_space<vmem>>, vector<1x64x32xf32>
    %141 = vector.shape_cast %140 : vector<1x64x32xf32> to vector<64x32xf32>
    %cst_61 = arith.constant dense<0.000000e+00> : vector<16x32xf32>
    %142 = tpu.matmul %139, %141, %cst_61 {dimension_numbers = #tpu.dot_dimension_numbers<[1], [0], [0], [1], [0, 0, 1, 1], [], []>} : vector<16x64xf32>, vector<64x32xf32>, vector<16x32xf32> -> vector<16x32xf32>
    %c0_62 = arith.constant 0 : index
    %c0_63 = arith.constant 0 : index
    %c0_64 = arith.constant 0 : index
    %143 = vector.load %arg14[%c0_62, %c0_63, %c0_64] : memref<2x1x32xf32, #tpu.memory_space<vmem>>, vector<1x1x32xf32>
    %144 = vector.shape_cast %143 : vector<1x1x32xf32> to vector<1x32xf32>
    %145 = vector.broadcast %144 : vector<1x32xf32> to vector<16x32xf32>
    %146 = arith.addf %142, %145 : vector<16x32xf32>
    %147 = arith.addf %130, %146 : vector<16x32xf32>
    %c0_65 = arith.constant 0 : index
    %c0_66 = arith.constant 0 : index
    %c0_67 = arith.constant 0 : index
    %148 = vector.load %arg17[%c0_65, %c0_66, %c0_67] : memref<2x1x32xf32, #tpu.memory_space<vmem>>, vector<1x1x32xf32>
    %149 = vector.shape_cast %148 : vector<1x1x32xf32> to vector<1x32xf32>
    %c0_68 = arith.constant 0 : index
    %c0_69 = arith.constant 0 : index
    %c0_70 = arith.constant 0 : index
    %150 = vector.load %arg18[%c0_68, %c0_69, %c0_70] : memref<2x1x32xf32, #tpu.memory_space<vmem>>, vector<1x1x32xf32>
    %151 = vector.shape_cast %150 : vector<1x1x32xf32> to vector<1x32xf32>
    %cst_71 = arith.constant dense<0.000000e+00> : vector<32xf32>
    %152 = vector.multi_reduction <add>, %147, %cst_71 [0] : vector<16x32xf32> to vector<32xf32>
    %153 = vector.shape_cast %152 : vector<32xf32> to vector<1x32xf32>
    %cst_72 = arith.constant 1.600000e+01 : f32
    %154 = vector.broadcast %cst_72 : f32 to vector<1x32xf32>
    %155 = arith.divf %153, %154 : vector<1x32xf32>
    %156 = vector.broadcast %155 : vector<1x32xf32> to vector<16x32xf32>
    %157 = arith.subf %147, %156 : vector<16x32xf32>
    %158 = arith.mulf %157, %157 : vector<16x32xf32>
    %cst_73 = arith.constant dense<0.000000e+00> : vector<32xf32>
    %159 = vector.multi_reduction <add>, %158, %cst_73 [0] : vector<16x32xf32> to vector<32xf32>
    %160 = vector.shape_cast %159 : vector<32xf32> to vector<1x32xf32>
    %cst_74 = arith.constant 1.600000e+01 : f32
    %161 = vector.broadcast %cst_74 : f32 to vector<1x32xf32>
    %162 = arith.divf %160, %161 : vector<1x32xf32>
    %163 = vector.broadcast %155 : vector<1x32xf32> to vector<16x32xf32>
    %164 = arith.subf %147, %163 : vector<16x32xf32>
    %cst_75 = arith.constant 9.99999974E-6 : f32
    %165 = vector.broadcast %cst_75 : f32 to vector<1x32xf32>
    %166 = arith.addf %162, %165 : vector<1x32xf32>
    %167 = math.rsqrt %166 : vector<1x32xf32>
    %168 = vector.broadcast %167 : vector<1x32xf32> to vector<16x32xf32>
    %169 = arith.mulf %164, %168 : vector<16x32xf32>
    %170 = vector.broadcast %149 : vector<1x32xf32> to vector<16x32xf32>
    %171 = arith.mulf %169, %170 : vector<16x32xf32>
    %172 = vector.broadcast %151 : vector<1x32xf32> to vector<16x32xf32>
    %173 = arith.addf %171, %172 : vector<16x32xf32>
    %c1 = arith.constant 1 : index
    %c0_76 = arith.constant 0 : index
    %c0_77 = arith.constant 0 : index
    %174 = vector.load %arg7[%c1, %c0_76, %c0_77] : memref<2x32x96xf32, #tpu.memory_space<vmem>>, vector<1x32x96xf32>
    %175 = vector.shape_cast %174 : vector<1x32x96xf32> to vector<32x96xf32>
    %cst_78 = arith.constant dense<0.000000e+00> : vector<16x96xf32>
    %176 = tpu.matmul %173, %175, %cst_78 {dimension_numbers = #tpu.dot_dimension_numbers<[1], [0], [0], [1], [0, 0, 1, 1], [], []>} : vector<16x32xf32>, vector<32x96xf32>, vector<16x96xf32> -> vector<16x96xf32>
    %c1_79 = arith.constant 1 : index
    %c0_80 = arith.constant 0 : index
    %c0_81 = arith.constant 0 : index
    %177 = vector.load %arg8[%c1_79, %c0_80, %c0_81] : memref<2x1x96xf32, #tpu.memory_space<vmem>>, vector<1x1x96xf32>
    %178 = vector.shape_cast %177 : vector<1x1x96xf32> to vector<1x96xf32>
    %179 = vector.broadcast %178 : vector<1x96xf32> to vector<16x96xf32>
    %180 = arith.addf %176, %179 : vector<16x96xf32>
    %181 = vector.extract_strided_slice %180 {offsets = [0, 0], sizes = [16, 32], strides = [1, 1]} : vector<16x96xf32> to vector<16x32xf32>
    %182 = vector.shape_cast %181 : vector<16x32xf32> to vector<2x8x32xf32>
    %183 = vector.extract_strided_slice %180 {offsets = [0, 32], sizes = [16, 32], strides = [1, 1]} : vector<16x96xf32> to vector<16x32xf32>
    %184 = vector.shape_cast %183 : vector<16x32xf32> to vector<2x8x32xf32>
    %185 = vector.extract_strided_slice %180 {offsets = [0, 64], sizes = [16, 32], strides = [1, 1]} : vector<16x96xf32> to vector<16x32xf32>
    %186 = vector.shape_cast %185 : vector<16x32xf32> to vector<2x8x32xf32>
    %187 = vector.extract_strided_slice %182 {offsets = [0, 0, 0], sizes = [2, 8, 8], strides = [1, 1, 1]} : vector<2x8x32xf32> to vector<2x8x8xf32>
    %188 = vector.extract_strided_slice %182 {offsets = [0, 0, 8], sizes = [2, 8, 8], strides = [1, 1, 1]} : vector<2x8x32xf32> to vector<2x8x8xf32>
    %189 = vector.extract_strided_slice %182 {offsets = [0, 0, 16], sizes = [2, 8, 8], strides = [1, 1, 1]} : vector<2x8x32xf32> to vector<2x8x8xf32>
    %190 = vector.extract_strided_slice %182 {offsets = [0, 0, 24], sizes = [2, 8, 8], strides = [1, 1, 1]} : vector<2x8x32xf32> to vector<2x8x8xf32>
    %191 = tpu.concatenate %187, %188, %189, %190 in 0 : vector<2x8x8xf32>, vector<2x8x8xf32>, vector<2x8x8xf32>, vector<2x8x8xf32> -> vector<8x8x8xf32>
    %192 = vector.extract_strided_slice %184 {offsets = [0, 0, 0], sizes = [2, 8, 8], strides = [1, 1, 1]} : vector<2x8x32xf32> to vector<2x8x8xf32>
    %193 = vector.extract_strided_slice %184 {offsets = [0, 0, 8], sizes = [2, 8, 8], strides = [1, 1, 1]} : vector<2x8x32xf32> to vector<2x8x8xf32>
    %194 = vector.extract_strided_slice %184 {offsets = [0, 0, 16], sizes = [2, 8, 8], strides = [1, 1, 1]} : vector<2x8x32xf32> to vector<2x8x8xf32>
    %195 = vector.extract_strided_slice %184 {offsets = [0, 0, 24], sizes = [2, 8, 8], strides = [1, 1, 1]} : vector<2x8x32xf32> to vector<2x8x8xf32>
    %196 = tpu.concatenate %192, %193, %194, %195 in 0 : vector<2x8x8xf32>, vector<2x8x8xf32>, vector<2x8x8xf32>, vector<2x8x8xf32> -> vector<8x8x8xf32>
    %197 = vector.extract_strided_slice %186 {offsets = [0, 0, 0], sizes = [2, 8, 8], strides = [1, 1, 1]} : vector<2x8x32xf32> to vector<2x8x8xf32>
    %198 = vector.extract_strided_slice %186 {offsets = [0, 0, 8], sizes = [2, 8, 8], strides = [1, 1, 1]} : vector<2x8x32xf32> to vector<2x8x8xf32>
    %199 = vector.extract_strided_slice %186 {offsets = [0, 0, 16], sizes = [2, 8, 8], strides = [1, 1, 1]} : vector<2x8x32xf32> to vector<2x8x8xf32>
    %200 = vector.extract_strided_slice %186 {offsets = [0, 0, 24], sizes = [2, 8, 8], strides = [1, 1, 1]} : vector<2x8x32xf32> to vector<2x8x8xf32>
    %201 = tpu.concatenate %197, %198, %199, %200 in 0 : vector<2x8x8xf32>, vector<2x8x8xf32>, vector<2x8x8xf32>, vector<2x8x8xf32> -> vector<8x8x8xf32>
    "tpu.trace_start"() <{level = 10 : i32, message = "bqd,bkd->bqk"}> : () -> ()
    %cst_82 = arith.constant dense<0.000000e+00> : vector<8x8x8xf32>
    %202 = tpu.matmul %191, %196, %cst_82 {dimension_numbers = #tpu.dot_dimension_numbers<[2], [2], [1], [1], [0, 0, 0, 1, 1, 1], [0], [0]>} : vector<8x8x8xf32>, vector<8x8x8xf32>, vector<8x8x8xf32> -> vector<8x8x8xf32>
    "tpu.trace_stop"() : () -> ()
    %cst_83 = arith.constant 0.353553385 : f32
    %203 = vector.broadcast %cst_83 : f32 to vector<8x8x8xf32>
    %204 = arith.mulf %202, %203 : vector<8x8x8xf32>
    %cst_84 = arith.constant dense<0xFF800000> : vector<8x8xf32>
    %205 = vector.multi_reduction <maximumf>, %204, %cst_84 [2] : vector<8x8x8xf32> to vector<8x8xf32>
    %206 = vector.shape_cast %205 : vector<8x8xf32> to vector<8x8x1xf32>
    %207 = vector.broadcast %206 : vector<8x8x1xf32> to vector<8x8x8xf32>
    %208 = arith.subf %204, %207 : vector<8x8x8xf32>
    %209 = math.exp %208 : vector<8x8x8xf32>
    %cst_85 = arith.constant dense<0.000000e+00> : vector<8x8xf32>
    %210 = vector.multi_reduction <add>, %209, %cst_85 [2] : vector<8x8x8xf32> to vector<8x8xf32>
    %211 = vector.shape_cast %210 : vector<8x8xf32> to vector<8x8x1xf32>
    %212 = tpu.reciprocal %211 {approx = true} : vector<8x8x1xf32> -> vector<8x8x1xf32>
    %213 = arith.mulf %211, %212 : vector<8x8x1xf32>
    %cst_86 = arith.constant 2.000000e+00 : f32
    %214 = vector.broadcast %cst_86 : f32 to vector<8x8x1xf32>
    %215 = arith.subf %214, %213 : vector<8x8x1xf32>
    %216 = arith.mulf %212, %215 : vector<8x8x1xf32>
    %217 = vector.broadcast %216 : vector<8x8x1xf32> to vector<8x8x8xf32>
    %218 = arith.mulf %209, %217 : vector<8x8x8xf32>
    "tpu.trace_start"() <{level = 10 : i32, message = "bqk,bkd->bqd"}> : () -> ()
    %cst_87 = arith.constant dense<0.000000e+00> : vector<8x8x8xf32>
    %219 = tpu.matmul %218, %201, %cst_87 {dimension_numbers = #tpu.dot_dimension_numbers<[2], [1], [1], [2], [0, 0, 0, 1, 1, 2], [0], [0]>} : vector<8x8x8xf32>, vector<8x8x8xf32>, vector<8x8x8xf32> -> vector<8x8x8xf32>
    "tpu.trace_stop"() : () -> ()
    %220 = vector.extract_strided_slice %219 {offsets = [0, 0, 0], sizes = [2, 8, 8], strides = [1, 1, 1]} : vector<8x8x8xf32> to vector<2x8x8xf32>
    %221 = vector.extract_strided_slice %219 {offsets = [2, 0, 0], sizes = [2, 8, 8], strides = [1, 1, 1]} : vector<8x8x8xf32> to vector<2x8x8xf32>
    %222 = vector.extract_strided_slice %219 {offsets = [4, 0, 0], sizes = [2, 8, 8], strides = [1, 1, 1]} : vector<8x8x8xf32> to vector<2x8x8xf32>
    %223 = vector.extract_strided_slice %219 {offsets = [6, 0, 0], sizes = [2, 8, 8], strides = [1, 1, 1]} : vector<8x8x8xf32> to vector<2x8x8xf32>
    %224 = tpu.concatenate %220, %221, %222, %223 in 2 : vector<2x8x8xf32>, vector<2x8x8xf32>, vector<2x8x8xf32>, vector<2x8x8xf32> -> vector<2x8x32xf32>
    %225 = vector.shape_cast %224 : vector<2x8x32xf32> to vector<16x32xf32>
    %c1_88 = arith.constant 1 : index
    %c0_89 = arith.constant 0 : index
    %c0_90 = arith.constant 0 : index
    %226 = vector.load %arg9[%c1_88, %c0_89, %c0_90] : memref<2x32x32xf32, #tpu.memory_space<vmem>>, vector<1x32x32xf32>
    %227 = vector.shape_cast %226 : vector<1x32x32xf32> to vector<32x32xf32>
    %cst_91 = arith.constant dense<0.000000e+00> : vector<16x32xf32>
    %228 = tpu.matmul %225, %227, %cst_91 {dimension_numbers = #tpu.dot_dimension_numbers<[1], [0], [0], [1], [0, 0, 1, 1], [], []>} : vector<16x32xf32>, vector<32x32xf32>, vector<16x32xf32> -> vector<16x32xf32>
    %c1_92 = arith.constant 1 : index
    %c0_93 = arith.constant 0 : index
    %c0_94 = arith.constant 0 : index
    %229 = vector.load %arg10[%c1_92, %c0_93, %c0_94] : memref<2x1x32xf32, #tpu.memory_space<vmem>>, vector<1x1x32xf32>
    %230 = vector.shape_cast %229 : vector<1x1x32xf32> to vector<1x32xf32>
    %231 = vector.broadcast %230 : vector<1x32xf32> to vector<16x32xf32>
    %232 = arith.addf %228, %231 : vector<16x32xf32>
    %233 = arith.addf %173, %232 : vector<16x32xf32>
    %c1_95 = arith.constant 1 : index
    %c0_96 = arith.constant 0 : index
    %c0_97 = arith.constant 0 : index
    %234 = vector.load %arg15[%c1_95, %c0_96, %c0_97] : memref<2x1x32xf32, #tpu.memory_space<vmem>>, vector<1x1x32xf32>
    %235 = vector.shape_cast %234 : vector<1x1x32xf32> to vector<1x32xf32>
    %c1_98 = arith.constant 1 : index
    %c0_99 = arith.constant 0 : index
    %c0_100 = arith.constant 0 : index
    %236 = vector.load %arg16[%c1_98, %c0_99, %c0_100] : memref<2x1x32xf32, #tpu.memory_space<vmem>>, vector<1x1x32xf32>
    %237 = vector.shape_cast %236 : vector<1x1x32xf32> to vector<1x32xf32>
    %cst_101 = arith.constant dense<0.000000e+00> : vector<32xf32>
    %238 = vector.multi_reduction <add>, %233, %cst_101 [0] : vector<16x32xf32> to vector<32xf32>
    %239 = vector.shape_cast %238 : vector<32xf32> to vector<1x32xf32>
    %cst_102 = arith.constant 1.600000e+01 : f32
    %240 = vector.broadcast %cst_102 : f32 to vector<1x32xf32>
    %241 = arith.divf %239, %240 : vector<1x32xf32>
    %242 = vector.broadcast %241 : vector<1x32xf32> to vector<16x32xf32>
    %243 = arith.subf %233, %242 : vector<16x32xf32>
    %244 = arith.mulf %243, %243 : vector<16x32xf32>
    %cst_103 = arith.constant dense<0.000000e+00> : vector<32xf32>
    %245 = vector.multi_reduction <add>, %244, %cst_103 [0] : vector<16x32xf32> to vector<32xf32>
    %246 = vector.shape_cast %245 : vector<32xf32> to vector<1x32xf32>
    %cst_104 = arith.constant 1.600000e+01 : f32
    %247 = vector.broadcast %cst_104 : f32 to vector<1x32xf32>
    %248 = arith.divf %246, %247 : vector<1x32xf32>
    %249 = vector.broadcast %241 : vector<1x32xf32> to vector<16x32xf32>
    %250 = arith.subf %233, %249 : vector<16x32xf32>
    %cst_105 = arith.constant 9.99999974E-6 : f32
    %251 = vector.broadcast %cst_105 : f32 to vector<1x32xf32>
    %252 = arith.addf %248, %251 : vector<1x32xf32>
    %253 = math.rsqrt %252 : vector<1x32xf32>
    %254 = vector.broadcast %253 : vector<1x32xf32> to vector<16x32xf32>
    %255 = arith.mulf %250, %254 : vector<16x32xf32>
    %256 = vector.broadcast %235 : vector<1x32xf32> to vector<16x32xf32>
    %257 = arith.mulf %255, %256 : vector<16x32xf32>
    %258 = vector.broadcast %237 : vector<1x32xf32> to vector<16x32xf32>
    %259 = arith.addf %257, %258 : vector<16x32xf32>
    %c1_106 = arith.constant 1 : index
    %c0_107 = arith.constant 0 : index
    %c0_108 = arith.constant 0 : index
    %260 = vector.load %arg11[%c1_106, %c0_107, %c0_108] : memref<2x32x64xf32, #tpu.memory_space<vmem>>, vector<1x32x64xf32>
    %261 = vector.shape_cast %260 : vector<1x32x64xf32> to vector<32x64xf32>
    %cst_109 = arith.constant dense<0.000000e+00> : vector<16x64xf32>
    %262 = tpu.matmul %259, %261, %cst_109 {dimension_numbers = #tpu.dot_dimension_numbers<[1], [0], [0], [1], [0, 0, 1, 1], [], []>} : vector<16x32xf32>, vector<32x64xf32>, vector<16x64xf32> -> vector<16x64xf32>
    %c1_110 = arith.constant 1 : index
    %c0_111 = arith.constant 0 : index
    %c0_112 = arith.constant 0 : index
    %263 = vector.load %arg12[%c1_110, %c0_111, %c0_112] : memref<2x1x64xf32, #tpu.memory_space<vmem>>, vector<1x1x64xf32>
    %264 = vector.shape_cast %263 : vector<1x1x64xf32> to vector<1x64xf32>
    %265 = vector.broadcast %264 : vector<1x64xf32> to vector<16x64xf32>
    %266 = arith.addf %262, %265 : vector<16x64xf32>
    %cst_113 = arith.constant 0.000000e+00 : f32
    %267 = vector.broadcast %cst_113 : f32 to vector<16x64xf32>
    %268 = arith.maximumf %266, %267 : vector<16x64xf32>
    %c1_114 = arith.constant 1 : index
    %c0_115 = arith.constant 0 : index
    %c0_116 = arith.constant 0 : index
    %269 = vector.load %arg13[%c1_114, %c0_115, %c0_116] : memref<2x64x32xf32, #tpu.memory_space<vmem>>, vector<1x64x32xf32>
    %270 = vector.shape_cast %269 : vector<1x64x32xf32> to vector<64x32xf32>
    %cst_117 = arith.constant dense<0.000000e+00> : vector<16x32xf32>
    %271 = tpu.matmul %268, %270, %cst_117 {dimension_numbers = #tpu.dot_dimension_numbers<[1], [0], [0], [1], [0, 0, 1, 1], [], []>} : vector<16x64xf32>, vector<64x32xf32>, vector<16x32xf32> -> vector<16x32xf32>
    %c1_118 = arith.constant 1 : index
    %c0_119 = arith.constant 0 : index
    %c0_120 = arith.constant 0 : index
    %272 = vector.load %arg14[%c1_118, %c0_119, %c0_120] : memref<2x1x32xf32, #tpu.memory_space<vmem>>, vector<1x1x32xf32>
    %273 = vector.shape_cast %272 : vector<1x1x32xf32> to vector<1x32xf32>
    %274 = vector.broadcast %273 : vector<1x32xf32> to vector<16x32xf32>
    %275 = arith.addf %271, %274 : vector<16x32xf32>
    %276 = arith.addf %259, %275 : vector<16x32xf32>
    %c1_121 = arith.constant 1 : index
    %c0_122 = arith.constant 0 : index
    %c0_123 = arith.constant 0 : index
    %277 = vector.load %arg17[%c1_121, %c0_122, %c0_123] : memref<2x1x32xf32, #tpu.memory_space<vmem>>, vector<1x1x32xf32>
    %278 = vector.shape_cast %277 : vector<1x1x32xf32> to vector<1x32xf32>
    %c1_124 = arith.constant 1 : index
    %c0_125 = arith.constant 0 : index
    %c0_126 = arith.constant 0 : index
    %279 = vector.load %arg18[%c1_124, %c0_125, %c0_126] : memref<2x1x32xf32, #tpu.memory_space<vmem>>, vector<1x1x32xf32>
    %280 = vector.shape_cast %279 : vector<1x1x32xf32> to vector<1x32xf32>
    %cst_127 = arith.constant dense<0.000000e+00> : vector<32xf32>
    %281 = vector.multi_reduction <add>, %276, %cst_127 [0] : vector<16x32xf32> to vector<32xf32>
    %282 = vector.shape_cast %281 : vector<32xf32> to vector<1x32xf32>
    %cst_128 = arith.constant 1.600000e+01 : f32
    %283 = vector.broadcast %cst_128 : f32 to vector<1x32xf32>
    %284 = arith.divf %282, %283 : vector<1x32xf32>
    %285 = vector.broadcast %284 : vector<1x32xf32> to vector<16x32xf32>
    %286 = arith.subf %276, %285 : vector<16x32xf32>
    %287 = arith.mulf %286, %286 : vector<16x32xf32>
    %cst_129 = arith.constant dense<0.000000e+00> : vector<32xf32>
    %288 = vector.multi_reduction <add>, %287, %cst_129 [0] : vector<16x32xf32> to vector<32xf32>
    %289 = vector.shape_cast %288 : vector<32xf32> to vector<1x32xf32>
    %cst_130 = arith.constant 1.600000e+01 : f32
    %290 = vector.broadcast %cst_130 : f32 to vector<1x32xf32>
    %291 = arith.divf %289, %290 : vector<1x32xf32>
    %292 = vector.broadcast %284 : vector<1x32xf32> to vector<16x32xf32>
    %293 = arith.subf %276, %292 : vector<16x32xf32>
    %cst_131 = arith.constant 9.99999974E-6 : f32
    %294 = vector.broadcast %cst_131 : f32 to vector<1x32xf32>
    %295 = arith.addf %291, %294 : vector<1x32xf32>
    %296 = math.rsqrt %295 : vector<1x32xf32>
    %297 = vector.broadcast %296 : vector<1x32xf32> to vector<16x32xf32>
    %298 = arith.mulf %293, %297 : vector<16x32xf32>
    %299 = vector.broadcast %278 : vector<1x32xf32> to vector<16x32xf32>
    %300 = arith.mulf %298, %299 : vector<16x32xf32>
    %301 = vector.broadcast %280 : vector<1x32xf32> to vector<16x32xf32>
    %302 = arith.addf %300, %301 : vector<16x32xf32>
    %c0_132 = arith.constant 0 : index
    %c0_133 = arith.constant 0 : index
    %303 = vector.load %arg19[%c0_132, %c0_133] : memref<16x32xf32, #tpu.memory_space<vmem>>, vector<16x32xf32>
    tpu.vector_store %arg19[%c0_132, %c0_133], %302 {strides = array<i32>} : memref<16x32xf32, #tpu.memory_space<vmem>>, vector<16x32xf32>,
    return
  }
}

</mosaic_0001>

<bundles_post_ra>
// kernel: state_encoder_tsp_forward.1
= control target key start
LH: loop header
LB: loop body
LE: loop exit
PB: predicated region body
PF: predicated region fallthrough
CT: control target
= control target key end

     0   :  { %s5711_s0 = inlined_call_operand.vmem [shape: f32[2,8,2], index: 0, kind: input, shape index: {}]   ;;  %s5712_s1 = inlined_call_operand.vmem [shape: f32[2,32], index: 1, kind: input, shape index: {}]   ;;  %s5713_s2 = inlined_call_operand.vmem [shape: f32[1,32], index: 2, kind: input, shape index: {}]   ;;  %s5714_s3 = inlined_call_operand.vmem [shape: f32[2,32], index: 3, kind: input, shape index: {}]   ;;  %s5715_s4 = inlined_call_operand.vmem [shape: f32[1,32], index: 4, kind: input, shape index: {}]   ;;  %s5716_s5 = inlined_call_operand.vmem [shape: f32[2,32], index: 5, kind: input, shape index: {}]   ;;  %s5717_s6 = inlined_call_operand.vmem [shape: f32[1,32], index: 6, kind: input, shape index: {}]   ;;  %s5718_s7 = inlined_call_operand.vmem [shape: f32[2,32,96], index: 7, kind: input, shape index: {}]   ;;  %s5719_s8 = inlined_call_operand.vmem [shape: f32[2,1,96], index: 8, kind: input, shape index: {}]   ;;  %s5720_s9 = inlined_call_operand.vmem [shape: f32[2,32,32], index: 9, kind: input, shape index: {}]   ;;  %s5721_s10 = inlined_call_operand.vmem [shape: f32[2,1,32], index: 10, kind: input, shape index: {}]   ;;  %s5722_s11 = inlined_call_operand.vmem [shape: f32[2,32,64], index: 11, kind: input, shape index: {}]   ;;  %s5723_s12 = inlined_call_operand.vmem [shape: f32[2,1,64], index: 12, kind: input, shape index: {}]   ;;  %s5724_s13 = inlined_call_operand.vmem [shape: f32[2,64,32], index: 13, kind: input, shape index: {}]   ;;  %s5725_s14 = inlined_call_operand.vmem [shape: f32[2,1,32], index: 14, kind: input, shape index: {}]   ;;  %s5726_s15 = inlined_call_operand.vmem [shape: f32[2,1,32], index: 15, kind: input, shape index: {}]   ;;  %s5727_s16 = inlined_call_operand.vmem [shape: f32[2,1,32], index: 16, kind: input, shape index: {}]   ;;  %s5728_s17 = inlined_call_operand.vmem [shape: f32[2,1,32], index: 17, kind: input, shape index: {}]   ;;  %s5729_s18 = inlined_call_operand.vmem [shape: f32[2,1,32], index: 18, kind: input, shape index: {}]   ;;  %s5730_s19 = inlined_call_operand.hbm [shape: f32[16,32], index: 19, kind: output, shape index: {}]  }
   0x1   :  { %5732 = sst [smem:[#allocation5_spill]] %s5711_s0 }
   0x2   :  { %5733 = sst [smem:[#allocation6_spill]] %s5712_s1 }
   0x3   :  { %5734 = sst [smem:[#allocation7_spill]] %s5713_s2 }
   0x4   :  { %5735 = sst [smem:[#allocation8_spill]] %s5714_s3 }
   0x5   :  { %s5736_s20 = sld [smem:[#allocation6_spill]]  ;;  %vm118_vm0 = vcmask 1041408   ;;  %s5737_s22 = sld [smem:[#allocation5_spill]]  ;;  %vm65_vm1 = vcmask 15360   ;;  %v4919_v16 = vmov 0.0  }
   0x6   :  { %s5738_s3 = sld [smem:[#allocation8_spill]] }
   0xb   :  { %v104_v0 = vld [vmem:[%s5736_s20] sm:$0x3]  ;;  %v64_v2 = vld [vmem:[%s5737_s22 + $0x8] sm:$0xff] }
   0xc   :  { %v63_v1 = vld [vmem:[%s5737_s22] sm:$0xff]  ;;  %4445 = vmatprep.subr.msk.mxu0 %vm118_vm0, %v104_v0  ;;  %v73_v5 = vsel %vm65_vm1, %v64_v2, inf  ;;  %v87_v6 = vsel %vm65_vm1, %v64_v2, -inf }
   0xd   :  { %v66_v3 = vsel %vm65_vm1, %v63_v1, inf  ;;  %v80_v4 = vsel %vm65_vm1, %v63_v1, -inf  ;;  %4446 = vmatpush3.msk.msra.mxu0 %vm118_vm0, %v104_v0  ;;  %v74_v9 = vrot.slane %v73_v5, 4  ;;  %v88_v10 = vrot.slane %v87_v6, 4  ;;  %v197_v11 = vld [vmem:[%s5738_s3] sm:$0x3] }
   0xe   :  { %v67_v7 = vrot.slane %v66_v3, 4  ;;  %v81_v8 = vrot.slane %v80_v4, 4  ;;  %4455 = vmatprep.subr.mxu0 %v4919_v16 }
   0xf   :  { %v75_v14 = vmin.f32 %v73_v5, %v74_v9  ;;  %v89_v15 = vmax.f32 %v87_v6, %v88_v10 }
  0x10   :  { %v68_v12 = vmin.f32 %v66_v3, %v67_v7  ;;  %v82_v13 = vmax.f32 %v80_v4, %v81_v8 }
  0x11   :  { %24 = vsyncpa [#allocation3], 0  ;;  %4450 = vmatprep.subr.mxu1 %v4919_v16  ;;  %vm4920_vm2 = vmmov 0   ;;  %v76_v19 = vrot.slane %v75_v14, 2  ;;  %v90_v20 = vrot.slane %v89_v15, 2  ;;  %vm201_vm3 = vcmask 1041409  }
  0x12   :  { %4452 = vmatprep.mubr.msk.f32.mxu1 %vm4920_vm2, %v4919_v16  ;;  %v69_v17 = vrot.slane %v68_v12, 2  ;;  %v83_v18 = vrot.slane %v82_v13, 2  ;;  %4451 = vmatpush3.msk.msra.mxu1 %vm118_vm0, %v197_v11  ;;  %v318_v43 = vld [vmem:[%s5716_s5] sm:$0x3]  ;;  %v467_v51 = vld [vmem:[%s5718_s7 + $0x8] sm:$0xff]  ;;  %v468_v53 = vld [vmem:[%s5718_s7 + $0x10] sm:$0xff]  ;;  %v208_v58 = vlaneseq }
  0x13   :  { %4481 = vmatprep.subr.mxu1 %v4919_v16  ;;  %v77_v23 = vmin.f32 %v75_v14, %v76_v19  ;;  %v91_v24 = vmax.f32 %v89_v15, %v90_v20  ;;  %v466_v50 = vld [vmem:[%s5718_s7] sm:$0xff]  ;;  %v469_v54 = vld [vmem:[%s5718_s7 + $0x18] sm:$0xff]  ;;  %v4921_v56 = vmov 1966171168   ;;  %s5739_s3 = sld [smem:[#allocation7_spill]]  ;;  %vm477_vm6 = vcmask 261120  }
  0x14   :  { %v70_v21 = vmin.f32 %v68_v12, %v69_v17  ;;  %v84_v22 = vmax.f32 %v82_v13, %v83_v18  ;;  %v4724_v52 = vpack.c.bf16 %v467_v51, %v466_v50  ;;  %v4728_v55 = vpack.c.bf16 %v469_v54, %v468_v53  ;;  %v4817_v61 = vld [vmem:[%s5715_s4] ss:$0 sps:$4 sm:$0x11]   ;;  %s4922_s27 = smov 112   ;;  %s4923_s5 = smov 120  }
  0x15   :  { %v78_v27 = vrot.slane %v77_v23, 1  ;;  %v92_v28 = vrot.slane %v91_v24, 1  ;;  %v206_v57 = vunpack.c.l.s4 %v4921_v56  ;;  %v209_v60 = vshrl.u32 %v208_v58, 7  ;;  %v4818_v63 = vld [vmem:[%s5717_s6] ss:$0 sps:$4 sm:$0x11]  }
  0x16   :  { %v71_v25 = vrot.slane %v70_v21, 1  ;;  %v85_v26 = vrot.slane %v84_v22, 1  ;;  %s4924_s28 = smov 104   ;;  %s4925_s29 = smov 96   ;;  %vm575_vm7 = vcmask 64512   ;;  %vm1936_vm8 = vcmask 130048  }
  0x17   :  { %v79_v31 = vmin.f32 %v77_v23, %v78_v27  ;;  %v93_v32 = vmax.f32 %v91_v24, %v92_v28  ;;  %v207_v59 = vunpack.c.0.s8 %v206_v57  ;;  %v444_v13 = vsub.s32 0, %v209_v60  ;;  %s4926_s0 = smov 64   ;;  %s4927_s4 = smov 8  }
  0x18   :  { %v72_v29 = vmin.f32 %v70_v21, %v71_v25  ;;  %v86_v30 = vmax.f32 %v84_v22, %v85_v26  ;;  %vm441_vm4 = vcmp.eq.s32.totalorder %v209_v60, 7  ;;  %vm440_vm5 = vcmp.eq.s32.totalorder %v209_v60, 6  ;;  %s4928_s25 = smov 16   ;;  %s4930_s22 = smov [#allocation2]  }
  0x19   :  { %v97_v34 = vsub.f32 %v93_v32, %v79_v31  ;;  %v95_v38 = vsub.f32 %v64_v2, %v79_v31  ;;  %v210_v62 = vsub.s32 %v207_v59, %v209_v60  ;;  %v4202_v15 = vld [vmem:[%s5739_s3] ss:$0 sm:$0xff]  ;;  %s4929_s3 = smov 24   ;;  %vm1939_vm9 = vcmask 195584  }
  0x1a   :  { %v96_v33 = vsub.f32 %v86_v30, %v72_v29  ;;  %v94_v37 = vsub.f32 %v63_v1, %v72_v29  ;;  %vm2192_vm10 = vcmask 523264  }
  0x1b   :  { %v99_v36 = vadd.f32 1e-10, %v97_v34  ;;  %v211_v0 = vrot.slane %v4817_v61, %v210_v62  ;;  %v331_v1 = vrot.slane %v4818_v63, %v210_v62 }
  0x1c   :  { %v98_v35 = vadd.f32 1e-10, %v96_v33  ;;  %v4210_v33 = vld [vmem:[%s5719_s8] ss:$0 sm:$0xff] }
  0x1d   :  { %v218_v3 = vrot.slane %v211_v0, %v210_v62  ;;  %v338_v5 = vrot.slane %v331_v1, %v210_v62 }
  0x1e   :  { %4819 = vrcp.f32 %v98_v35 }
  0x1f   :  { %4821 = vrcp.f32 %v99_v36 }
  0x28   :  { %v4820_v39 = vpop.eup %4819 }
  0x29   :  { %v4822_v40 = vpop.eup %4821  ;;  %v101_v41 = vmul.f32 %v4820_v39, %v94_v37 }
  0x2a   :  { %v103_v42 = vmul.f32 %v4822_v40, %v95_v38 }
  0x2b   :  { %4447 = vmatprep.mubr.msk.f32.mxu0 %vm65_vm1, %v101_v41  ;;  %v320_v44 = vrot.slane %v101_v41, 7  ;;  %v199_v45 = vrot.slane %v101_v41, 6 }
  0x2c   :  { %4448 = vmatmul.mubr.msk.f32.vlgmr.msra.gmra.mrb[0].mxu0 %vm65_vm1, %v103_v42  ;;  %v200_v46 = vrot.slane %v103_v42, 5  ;;  %v321_v47 = vrot.slane %v103_v42, 6 }
  0x2d   :  { %4456 = vmatpush3.msk.msra.mxu0 %vm118_vm0, %v318_v43  ;;  %4457 = vmatprep.mubr.msk.f32.mxu0 %vm4920_vm2, %v4919_v16 }
  0x2e   :  { %v202_v48 = vsel %vm201_vm3, %v200_v46, %v199_v45  ;;  %v322_v49 = vsel %vm201_vm3, %v321_v47, %v320_v44  ;;  %4725 = vmatprep.subr.bf16.mxu0 %v4724_v52 }
  0x2f   :  { %4453 = vmatmul.mubr.msk.f32.vlgmr.msra.gmra.mrb[0].mxu1 %vm65_vm1, %v202_v48 }
  0x30   :  { %4458 = vmatmul.mubr.msk.f32.vlgmr.msra.gmra.mrb[2].mxu0 %vm65_vm1, %v322_v49  ;;  %4483 = vmatprep.mubr.msk.f32.mxu1 %vm4920_vm2, %v4919_v16 }
  0x31   :  { %4727 = vmatpush3.bf16.msra.mxu0 %v4724_v52 }
  0x32   :  { %4729 = vmatprep.subr.bf16.mxu0 %v4728_v55 }
  0x35   :  { %4731 = vmatpush3.bf16.msra.mxu0 %v4728_v55 }
  0x36   :  { %4471 = vmatprep.subr.mxu0 %v4919_v16 }
  0xff   :  { %v4449_v2 = vpop.f32.mrb[0].mxu0 }
 0x100   :  { %v188_v4 = vpop.f32.mrb[1].mxu0  ;;  %v194_v27 = vadd.f32 %v4449_v2, %v4202_v15 }
 0x101   :  { %v189_v23 = vadd.f32 %v4202_v15, %v188_v4 }
 0x102   :  { %v291_v6 = vpop.f32.mrb[0].mxu1 }
 0x103   :  { %v292_v7 = vadd.f32 %v291_v6, %v218_v3  ;;  %v411_v8 = vpop.f32.mrb[2].mxu0  ;;  %v4454_v9 = vpop.f32.mrb[1].mxu1 }
 0x104   :  { %v412_v10 = vadd.f32 %v411_v8, %v338_v5  ;;  %v4459_v11 = vpop.f32.mrb[3].mxu0 }
 0x105   :  { %v302_v12 = vrot.slane %v292_v7, %v210_v62 }
 0x106   :  { %v422_v14 = vrot.slane %v412_v10, %v210_v62 }
 0x107   :  { %v303_v17 = vcombine.high %v302_v12, %v302_v12  ;;  %v310_v18 = vrot.slane %v302_v12, %v210_v62 }
 0x108   :  { %v423_v19 = vcombine.high %v422_v14, %v422_v14  ;;  %v430_v20 = vrot.slane %v422_v14, %v210_v62 }
 0x109   :  { %v317_v21 = vrot.slane %v303_v17, %v210_v62  ;;  %v457_v22 = vrot.slane %v310_v18, %v444_v13 }
 0x10a   :  { %v437_v24 = vrot.slane %v423_v19, %v210_v62  ;;  %v445_v25 = vrot.slane %v430_v20, %v444_v13 }
 0x10b   :  { %v461_v26 = vrot.slane %v317_v21, %v444_v13 }
 0x10c   :  { %v449_v28 = vrot.slane %v437_v24, %v444_v13  ;;  %v452_v29 = vsel %vm441_vm4, %v445_v25, %v189_v23 }
 0x10d   :  { %v5090_v30 = vsel %vm440_vm5, %v457_v22, %v452_v29 }
 0x10e   :  { %4468 = vmatprep.mubr.msk.f32.mxu0 %vm477_vm6, %v5090_v30  ;;  %v453_v31 = vsel %vm441_vm4, %v449_v28, %v194_v27 }
 0x10f   :  { %v5094_v32 = vsel %vm440_vm5, %v461_v26, %v453_v31 }
 0x110   :  { %4469 = vmatmul.mubr.msk.f32.vlgmr.msra.gmra.mrb[4].mxu0 %vm477_vm6, %v5094_v32 }
 0x111   :  { %4473 = vmatprep.mubr.msk.f32.mxu0 %vm4920_vm2, %v4919_v16 }
 0x1e3   :  { %v4470_v34 = vpop.f32.mrb[4].mxu0 }
 0x1e4   :  { %v550_v35 = vpop.f32.mrb[5].mxu0  ;;  %v5109_v37 = vadd.f32 %v4470_v34, %v4210_v33 }
 0x1e5   :  { %v5103_v36 = vadd.f32 %v4210_v33, %v550_v35 }
 0x1e7   :  { %565 = vrot.lane.b32.xlu1 %v5103_v36, %s4922_s27  ;;  %561 = vrot.lane.b32.xlu0 %v5103_v36, %s4923_s5 }
 0x1eb   :  { %567 = vrot.lane.b32.xlu1 %v5109_v37, %s4922_s27  ;;  %563 = vrot.lane.b32.xlu0 %v5109_v37, %s4923_s5 }
 0x1ef   :  { %571 = vrot.lane.b32.xlu1 %v5109_v37, %s4924_s28  ;;  %569 = vrot.lane.b32.xlu0 %v5103_v36, %s4924_s28 }
 0x1f3   :  { %650 = vrot.lane.b32.xlu1 %v5109_v37, %s4925_s29  ;;  %573 = vrot.lane.b32.xlu0 %v5103_v36, %s4925_s29 }
 0x259   :  { %v5123_v38 = vpop.permute.xlu1 %565  ;;  %v5125_v39 = vpop.permute.xlu0 %561 }
 0x25a   :  { %726 = vrot.lane.b32.xlu0 %v5125_v39, %s4925_s29 }
 0x25d   :  { %v5129_v40 = vpop.permute.xlu1 %567  ;;  %v5131_v41 = vpop.permute.xlu0 %563 }
 0x25e   :  { %878 = vrot.lane.b32.xlu0 %v5123_v38, %s4925_s29  ;;  %802 = vrot.lane.b32.xlu1 %v5131_v41, %s4925_s29 }
 0x261   :  { %v5137_v42 = vpop.permute.xlu0 %569  ;;  %v5143_v43 = vpop.permute.xlu1 %571 }
 0x262   :  { %954 = vrot.lane.b32.xlu1 %v5129_v40, %s4925_s29  ;;  %1030 = vrot.lane.b32.xlu0 %v5137_v42, %s4925_s29 }
 0x265   :  { %v574_v44 = vpop.permute.xlu0 %573  ;;  %v651_v45 = vpop.permute.xlu1 %650 }
 0x266   :  { %1106 = vrot.lane.b32.xlu1 %v5143_v43, %s4925_s29  ;;  %4472 = vmatpush3.xpose.msk.msra.mxu0 %vm575_vm7, %v574_v44 }
 0x267   :  { %4476 = vmatprep.subr.mxu0 %v4919_v16 }
 0x269   :  { %4474 = vmatmul.mubr.msk.f32.vlgmr.msra.gmra.mrb[6].mxu0 %vm575_vm7, %v5103_v36 }
 0x26a   :  { %4477 = vmatpush3.xpose.msk.msra.mxu0 %vm575_vm7, %v651_v45  ;;  %4478 = vmatprep.mubr.msk.f32.mxu0 %vm4920_vm2, %v4919_v16 }
 0x26b   :  { %4486 = vmatprep.subr.mxu0 %v4919_v16 }
 0x26d   :  { %4479 = vmatmul.mubr.msk.f32.vlgmr.msra.gmra.mrb[8].mxu0 %vm575_vm7, %v5109_v37 }
 0x26e   :  { %4488 = vmatprep.mubr.msk.f32.mxu0 %vm4920_vm2, %v4919_v16 }
 0x2cc   :  { %v727_v46 = vpop.permute.xlu0 %726 }
 0x2cd   :  { %4482 = vmatpush3.xpose.msk.msra.mxu1 %vm575_vm7, %v727_v46 }
 0x2ce   :  { %4491 = vmatprep.subr.mxu1 %v4919_v16 }
 0x2d0   :  { %v803_v47 = vpop.permute.xlu1 %802  ;;  %4484 = vmatmul.mubr.msk.f32.vlgmr.msra.gmra.mrb[2].mxu1 %vm575_vm7, %v5125_v39  ;;  %v879_v48 = vpop.permute.xlu0 %878 }
 0x2d1   :  { %4487 = vmatpush3.xpose.msk.msra.mxu0 %vm575_vm7, %v803_v47  ;;  %4492 = vmatpush3.xpose.msk.msra.mxu1 %vm575_vm7, %v879_v48 }
 0x2d2   :  { %4493 = vmatprep.mubr.msk.f32.mxu1 %vm4920_vm2, %v4919_v16  ;;  %4496 = vmatprep.subr.mxu0 %v4919_v16 }
 0x2d3   :  { %4501 = vmatprep.subr.mxu1 %v4919_v16 }
 0x2d4   :  { %v955_v49 = vpop.permute.xlu1 %954  ;;  %4489 = vmatmul.mubr.msk.f32.vlgmr.msra.gmra.mrb[10].mxu0 %vm575_vm7, %v5131_v41  ;;  %4494 = vmatmul.mubr.msk.f32.vlgmr.msra.gmra.mrb[4].mxu1 %vm575_vm7, %v5123_v38  ;;  %v1031_v50 = vpop.permute.xlu0 %1030 }
 0x2d5   :  { %4497 = vmatpush3.xpose.msk.msra.mxu0 %vm575_vm7, %v955_v49  ;;  %4502 = vmatpush3.xpose.msk.msra.mxu1 %vm575_vm7, %v1031_v50 }
 0x2d6   :  { %4498 = vmatprep.mubr.msk.f32.mxu0 %vm4920_vm2, %v4919_v16  ;;  %4503 = vmatprep.mubr.msk.f32.mxu1 %vm4920_vm2, %v4919_v16 }
 0x2d7   :  { %4506 = vmatprep.subr.mxu0 %v4919_v16  ;;  %4511 = vmatprep.subr.mxu1 %v4919_v16 }
 0x2d8   :  { %v1107_v51 = vpop.permute.xlu1 %1106  ;;  %4499 = vmatmul.mubr.msk.f32.vlgmr.msra.gmra.mrb[12].mxu0 %vm575_vm7, %v5129_v40  ;;  %4504 = vmatmul.mubr.msk.f32.vlgmr.msra.gmra.mrb[6].mxu1 %vm575_vm7, %v5137_v42 }
 0x2d9   :  { %4507 = vmatpush3.xpose.msk.msra.mxu0 %vm575_vm7, %v1107_v51  ;;  %4508 = vmatprep.mubr.msk.f32.mxu0 %vm4920_vm2, %v4919_v16 }
 0x2da   :  { %4516 = vmatprep.subr.mxu0 %v4919_v16  ;;  %4513 = vmatprep.mubr.msk.f32.mxu1 %vm4920_vm2, %v4919_v16 }
 0x2dc   :  { %4509 = vmatmul.mubr.msk.f32.vlgmr.msra.gmra.mrb[14].mxu0 %vm575_vm7, %v5143_v43 }
 0x2dd   :  { %4518 = vmatprep.mubr.msk.f32.mxu0 %vm4920_vm2, %v4919_v16 }
 0x33c   :  { %v646_v52 = vpop.f32.mrb[6].mxu0 }
 0x33d   :  { %v1182_v53 = vmul.f32 0.35355338, %v646_v52  ;;  %v4475_v54 = vpop.f32.mrb[7].mxu0 }
 0x33f   :  { %v1190_v55 = vsel %vm575_vm7, %v1182_v53, -inf }
 0x340   :  { %1191 = vmax.xlane.f32.xlu0 %v1190_v55  ;;  %v722_v56 = vpop.f32.mrb[8].mxu0 }
 0x341   :  { %v1183_v57 = vmul.f32 0.35355338, %v722_v56  ;;  %v4480_v58 = vpop.f32.mrb[9].mxu0 }
 0x343   :  { %v1193_v59 = vsel %vm575_vm7, %v1183_v57, -inf }
 0x344   :  { %1194 = vmax.xlane.f32.xlu1 %v1193_v59 }
 0x3a3   :  { %v798_v60 = vpop.f32.mrb[2].mxu1 }
 0x3a4   :  { %v1184_v61 = vmul.f32 0.35355338, %v798_v60  ;;  %v4485_v62 = vpop.f32.mrb[3].mxu1 }
 0x3a6   :  { %v1196_v63 = vsel %vm575_vm7, %v1184_v61, -inf }
 0x3a7   :  { %v874_v0 = vpop.f32.mrb[10].mxu0  ;;  %1197 = vmax.xlane.f32.xlu0 %v1196_v63  ;;  %v950_v1 = vpop.f32.mrb[4].mxu1 }
 0x3a8   :  { %v1185_v2 = vmul.f32 0.35355338, %v874_v0  ;;  %v1186_v3 = vmul.f32 0.35355338, %v950_v1  ;;  %v4490_v4 = vpop.f32.mrb[11].mxu0  ;;  %v4495_v5 = vpop.f32.mrb[5].mxu1 }
 0x3aa   :  { %v1199_v6 = vsel %vm575_vm7, %v1185_v2, -inf  ;;  %v1202_v7 = vsel %vm575_vm7, %v1186_v3, -inf }
 0x3ab   :  { %v1026_v8 = vpop.f32.mrb[12].mxu0  ;;  %1200 = vmax.xlane.f32.xlu0 %v1199_v6  ;;  %1203 = vmax.xlane.f32.xlu1 %v1202_v7  ;;  %v1102_v9 = vpop.f32.mrb[6].mxu1 }
 0x3ac   :  { %v1187_v10 = vmul.f32 0.35355338, %v1026_v8  ;;  %v1188_v11 = vmul.f32 0.35355338, %v1102_v9  ;;  %v4500_v12 = vpop.f32.mrb[13].mxu0  ;;  %v4505_v13 = vpop.f32.mrb[7].mxu1 }
 0x3ae   :  { %v1205_v14 = vsel %vm575_vm7, %v1187_v10, -inf  ;;  %v1208_v15 = vsel %vm575_vm7, %v1188_v11, -inf }
 0x3af   :  { %v1178_v17 = vpop.f32.mrb[14].mxu0  ;;  %1206 = vmax.xlane.f32.xlu0 %v1205_v14  ;;  %1209 = vmax.xlane.f32.xlu1 %v1208_v15 }
 0x3b0   :  { %v1189_v18 = vmul.f32 0.35355338, %v1178_v17  ;;  %v4510_v19 = vpop.f32.mrb[15].mxu0 }
 0x3b2   :  { %v1211_v20 = vsel %vm575_vm7, %v1189_v18, -inf }
 0x3b3   :  { %1212 = vmax.xlane.f32.xlu0 %v1211_v20 }
 0x3c0   :  { %1302 = vrot.lane.b32.xlu1 %v5103_v36, %s4926_s0 }
 0x3c4   :  { %1454 = vrot.lane.b32.xlu1 %v5125_v39, %s4926_s0 }
 0x3c8   :  { %1530 = vrot.lane.b32.xlu1 %v5131_v41, %s4926_s0 }
 0x3c9   :  { %1378 = vrot.lane.b32.xlu0 %v5109_v37, %s4926_s0 }
 0x3cc   :  { %1682 = vrot.lane.b32.xlu1 %v5129_v40, %s4926_s0 }
 0x3cd   :  { %1606 = vrot.lane.b32.xlu0 %v5123_v38, %s4926_s0  ;;  %v1192_v23 = vpop.xlane.xlu0 %1191 }
 0x3ce   :  { %v1214_v24 = vsub.f32 %v1182_v53, %v1192_v23 }
 0x3d0   :  { %v1222_v26 = vmul.f32 1.442695, %v1214_v24 }
 0x3d1   :  { %v1195_v21 = vpop.xlane.xlu1 %1194 }
 0x3d2   :  { %v1215_v22 = vsub.f32 %v1183_v57, %v1195_v21 }
 0x3d4   :  { %v1224_v25 = vmul.f32 1.442695, %v1215_v22 }
 0x3d6   :  { %4823 = vpow2.f32 %v1224_v25 }
 0x3d7   :  { %4825 = vpow2.f32 %v1222_v26 }
 0x3e0   :  { %v5215_v27 = vpop.eup %4823 }
 0x3e1   :  { %v1241_v28 = vsel %vm575_vm7, %v5215_v27, 0.0  ;;  %v5219_v29 = vpop.eup %4825 }
 0x3e2   :  { %v1238_v31 = vsel %vm575_vm7, %v5219_v29, 0.0 }
 0x3ec   :  { %1242 = vadd.xlane.f32.xlu0 %v1241_v28 }
 0x3f0   :  { %1239 = vadd.xlane.f32.xlu1 %v1238_v31 }
 0x434   :  { %v1198_v33 = vpop.xlane.xlu0 %1197 }
 0x435   :  { %v1216_v34 = vsub.f32 %v1184_v61, %v1198_v33 }
 0x437   :  { %v1226_v35 = vmul.f32 1.442695, %v1216_v34 }
 0x438   :  { %v1204_v36 = vpop.xlane.xlu1 %1203  ;;  %v1201_v37 = vpop.xlane.xlu0 %1200 }
 0x439   :  { %4827 = vpow2.f32 %v1226_v35  ;;  %v1218_v38 = vsub.f32 %v1186_v3, %v1204_v36  ;;  %v1217_v39 = vsub.f32 %v1185_v2, %v1201_v37 }
 0x43b   :  { %v1230_v40 = vmul.f32 1.442695, %v1218_v38  ;;  %v1228_v41 = vmul.f32 1.442695, %v1217_v39 }
 0x43c   :  { %v1210_v44 = vpop.xlane.xlu1 %1209  ;;  %v1207_v45 = vpop.xlane.xlu0 %1206 }
 0x43d   :  { %4829 = vpow2.f32 %v1230_v40  ;;  %v1220_v46 = vsub.f32 %v1188_v11, %v1210_v44  ;;  %v1219_v47 = vsub.f32 %v1187_v10, %v1207_v45 }
 0x43e   :  { %4831 = vpow2.f32 %v1228_v41 }
 0x43f   :  { %v1234_v48 = vmul.f32 1.442695, %v1220_v46  ;;  %v1232_v49 = vmul.f32 1.442695, %v1219_v47 }
 0x440   :  { %v1303_v50 = vpop.permute.xlu1 %1302  ;;  %v1213_v51 = vpop.xlane.xlu0 %1212 }
 0x441   :  { %4833 = vpow2.f32 %v1234_v48  ;;  %v1221_v52 = vsub.f32 %v1189_v18, %v1213_v51  ;;  %4512 = vmatpush3.msra.mxu1 %v1303_v50 }
 0x442   :  { %4835 = vpow2.f32 %v1232_v49  ;;  %4521 = vmatprep.subr.mxu1 %v4919_v16 }
 0x443   :  { %v5224_v53 = vpop.eup %4827  ;;  %v1236_v54 = vmul.f32 1.442695, %v1221_v52 }
 0x444   :  { %v1379_v55 = vpop.permute.xlu0 %1378  ;;  %v1244_v56 = vsel %vm575_vm7, %v5224_v53, 0.0  ;;  %v1455_v3 = vpop.permute.xlu1 %1454 }
 0x445   :  { %4837 = vpow2.f32 %v1236_v54  ;;  %1245 = vadd.xlane.f32.xlu1 %v1244_v56  ;;  %4517 = vmatpush3.msra.mxu0 %v1379_v55 }
 0x446   :  { %4526 = vmatprep.subr.mxu0 %v4919_v16 }
 0x447   :  { %v5229_v57 = vpop.eup %4829 }
 0x448   :  { %v5231_v58 = vpop.eup %4831  ;;  %v1250_v59 = vsel %vm575_vm7, %v5229_v57, 0.0  ;;  %v1531_v4 = vpop.permute.xlu1 %1530 }
 0x449   :  { %1251 = vadd.xlane.f32.xlu1 %v1250_v59  ;;  %v1247_v60 = vsel %vm575_vm7, %v5231_v58, 0.0  ;;  %v1607_v5 = vpop.permute.xlu0 %1606 }
 0x44a   :  { %1248 = vadd.xlane.f32.xlu0 %v1247_v60 }
 0x44b   :  { %v5237_v61 = vpop.eup %4833 }
 0x44c   :  { %v5239_v62 = vpop.eup %4835  ;;  %v1256_v63 = vsel %vm575_vm7, %v5237_v61, 0.0  ;;  %v5253_v6 = vpop.permute.xlu1 %1682 }
 0x44d   :  { %1257 = vadd.xlane.f32.xlu1 %v1256_v63  ;;  %v1253_v0 = vsel %vm575_vm7, %v5239_v62, 0.0 }
 0x44e   :  { %1254 = vadd.xlane.f32.xlu0 %v1253_v0  ;;  %v1942_v0 = vld [vmem:[%s5720_s9] sm:$0xff] }
 0x44f   :  { %v5245_v1 = vpop.eup %4837 }
 0x450   :  { %v1259_v2 = vsel %vm575_vm7, %v5245_v1, 0.0 }
 0x452   :  { %1260 = vadd.xlane.f32.xlu0 %v1259_v2  ;;  %v1943_v2 = vld [vmem:[%s5720_s9 + $0x8] sm:$0xff] }
 0x45e   :  { %1834 = vrot.lane.b32.xlu1 %v5143_v43, %s4926_s0 }
 0x468   :  { %1758 = vrot.lane.b32.xlu0 %v5137_v42, %s4926_s0 }
 0x479   :  { %v1243_v7 = vpop.xlane.xlu0 %1242 }
 0x47a   :  { %4839 = vrcp.f32 %v1243_v7 }
 0x47d   :  { %v1240_v8 = vpop.xlane.xlu1 %1239 }
 0x47e   :  { %4841 = vrcp.f32 %v1240_v8 }
 0x484   :  { %v4840_v9 = vpop.eup %4839 }
 0x485   :  { %v1271_v10 = vmul.f32 %v4840_v9, %v1243_v7 }
 0x487   :  { %v1279_v11 = vsub.f32 2.0, %v1271_v10 }
 0x488   :  { %v4842_v12 = vpop.eup %4841 }
 0x489   :  { %v1287_v13 = vmul.f32 %v4840_v9, %v1279_v11  ;;  %v1270_v14 = vmul.f32 %v4842_v12, %v1240_v8 }
 0x48b   :  { %v1295_v43 = vmul.f32 %v5215_v27, %v1287_v13  ;;  %v1278_v15 = vsub.f32 2.0, %v1270_v14 }
 0x48d   :  { %v1286_v17 = vmul.f32 %v4842_v12, %v1278_v15  ;;  %4519 = vmatmul.mubr.msk.f32.vlgmr.msra.gmra.mrb[16].mxu0 %vm575_vm7, %v1295_v43 }
 0x48e   :  { %4527 = vmatpush3.msra.mxu0 %v1531_v4  ;;  %4528 = vmatprep.mubr.msk.f32.mxu0 %vm4920_vm2, %v4919_v16  ;;  %v1945_v4 = vld [vmem:[%s5720_s9 + $0x18] sm:$0xff] }
 0x48f   :  { %v1294_v42 = vmul.f32 %v5219_v29, %v1286_v17  ;;  %4536 = vmatprep.subr.mxu0 %v4919_v16 }
 0x491   :  { %4514 = vmatmul.mubr.msk.f32.vlgmr.msra.gmra.mrb[8].mxu1 %vm575_vm7, %v1294_v42 }
 0x492   :  { %4522 = vmatpush3.msra.mxu1 %v1455_v3  ;;  %4523 = vmatprep.mubr.msk.f32.mxu1 %vm4920_vm2, %v4919_v16  ;;  %v4732_v3 = vpack.c.bf16 %v1943_v2, %v1942_v0 }
 0x493   :  { %4531 = vmatprep.subr.mxu1 %v4919_v16 }
 0x4d2   :  { %v1246_v18 = vpop.xlane.xlu1 %1245 }
 0x4d3   :  { %4843 = vrcp.f32 %v1246_v18 }
 0x4d6   :  { %v1252_v19 = vpop.xlane.xlu1 %1251 }
 0x4d7   :  { %4845 = vrcp.f32 %v1252_v19  ;;  %v1249_v20 = vpop.xlane.xlu0 %1248 }
 0x4d8   :  { %4847 = vrcp.f32 %v1249_v20 }
 0x4da   :  { %v1258_v21 = vpop.xlane.xlu1 %1257 }
 0x4db   :  { %4849 = vrcp.f32 %v1258_v21  ;;  %v1255_v22 = vpop.xlane.xlu0 %1254 }
 0x4dc   :  { %4851 = vrcp.f32 %v1255_v22 }
 0x4dd   :  { %v4844_v23 = vpop.eup %4843 }
 0x4de   :  { %v1272_v24 = vmul.f32 %v4844_v23, %v1246_v18 }
 0x4df   :  { %v1261_v25 = vpop.xlane.xlu0 %1260 }
 0x4e0   :  { %v1280_v26 = vsub.f32 2.0, %v1272_v24  ;;  %4853 = vrcp.f32 %v1261_v25 }
 0x4e1   :  { %v4846_v27 = vpop.eup %4845 }
 0x4e2   :  { %v4848_v28 = vpop.eup %4847  ;;  %v1288_v29 = vmul.f32 %v4844_v23, %v1280_v26  ;;  %v1274_v31 = vmul.f32 %v4846_v27, %v1252_v19 }
 0x4e3   :  { %v1273_v33 = vmul.f32 %v4848_v28, %v1249_v20  ;;  %v1759_v51 = vpop.permute.xlu0 %1758 }
 0x4e4   :  { %v1296_v34 = vmul.f32 %v5224_v53, %v1288_v29  ;;  %v1282_v35 = vsub.f32 2.0, %v1274_v31  ;;  %v2083_v29 = vld [vmem:[%s5722_s11] sm:$0xff]  ;;  %v2084_v31 = vld [vmem:[%s5722_s11 + $0x8] sm:$0xff] }
 0x4e5   :  { %v4850_v36 = vpop.eup %4849  ;;  %v1281_v37 = vsub.f32 2.0, %v1273_v33  ;;  %v4740_v33 = vpack.c.bf16 %v2084_v31, %v2083_v29 }
 0x4e6   :  { %v4852_v38 = vpop.eup %4851  ;;  %v1290_v39 = vmul.f32 %v4846_v27, %v1282_v35  ;;  %v1276_v40 = vmul.f32 %v4850_v36, %v1258_v21  ;;  %4524 = vmatmul.mubr.msk.f32.vlgmr.msra.gmra.mrb[10].mxu1 %vm575_vm7, %v1296_v34  ;;  %v2085_v34 = vld [vmem:[%s5722_s11 + $0x10] sm:$0xff]  ;;  %v2086_v35 = vld [vmem:[%s5722_s11 + $0x18] sm:$0xff] }
 0x4e7   :  { %v1289_v41 = vmul.f32 %v4848_v28, %v1281_v37  ;;  %v1275_v44 = vmul.f32 %v4852_v38, %v1255_v22  ;;  %4532 = vmatpush3.msra.mxu1 %v1607_v5  ;;  %4533 = vmatprep.mubr.msk.f32.mxu1 %vm4920_vm2, %v4919_v16  ;;  %v2177_v37 = vld [vmem:[%s5724_s13] sm:$0xff] }
 0x4e8   :  { %v1298_v45 = vmul.f32 %v5229_v57, %v1290_v39  ;;  %v1284_v46 = vsub.f32 2.0, %v1276_v40  ;;  %4541 = vmatprep.subr.mxu1 %v4919_v16  ;;  %v1835_v57 = vpop.permute.xlu1 %1834  ;;  %v2179_v39 = vld [vmem:[%s5724_s13 + $0x10] sm:$0xff] }
 0x4e9   :  { %v1297_v47 = vmul.f32 %v5231_v58, %v1289_v41  ;;  %v1283_v48 = vsub.f32 2.0, %v1275_v44  ;;  %v2180_v41 = vld [vmem:[%s5724_s13 + $0x18] sm:$0xff] }
 0x4ea   :  { %v4854_v49 = vpop.eup %4853  ;;  %v1292_v50 = vmul.f32 %v4850_v36, %v1284_v46  ;;  %4534 = vmatmul.mubr.msk.f32.vlgmr.msra.gmra.mrb[12].mxu1 %vm575_vm7, %v1298_v45  ;;  %v4744_v36 = vpack.c.bf16 %v2086_v35, %v2085_v34  ;;  %v4752_v44 = vpack.c.bf16 %v2180_v41, %v2179_v39  ;;  %v2181_v45 = vld [vmem:[%s5724_s13 + $0x20] sm:$0xff]  ;;  %v2182_v46 = vld [vmem:[%s5724_s13 + $0x28] sm:$0xff] }
 0x4eb   :  { %v1291_v52 = vmul.f32 %v4852_v38, %v1283_v48  ;;  %v1277_v53 = vmul.f32 %v4854_v49, %v1261_v25  ;;  %4529 = vmatmul.mubr.msk.f32.vlgmr.msra.gmra.mrb[18].mxu0 %vm575_vm7, %v1297_v47  ;;  %4542 = vmatpush3.msra.mxu1 %v1759_v51  ;;  %v2178_v38 = vld [vmem:[%s5724_s13 + $0x8] sm:$0xff]  ;;  %v4756_v47 = vpack.c.bf16 %v2182_v46, %v2181_v45  ;;  %v4237_v48 = vld [vmem:[%s5721_s10] ss:$0 sm:$0xff] }
 0x4ec   :  { %v1300_v54 = vmul.f32 %v5237_v61, %v1292_v50  ;;  %4537 = vmatpush3.msra.mxu0 %v5253_v6  ;;  %4538 = vmatprep.mubr.msk.f32.mxu0 %vm4920_vm2, %v4919_v16  ;;  %v4748_v40 = vpack.c.bf16 %v2178_v38, %v2177_v37  ;;  %v4250_v34 = vld [vmem:[%s5718_s7 + $0x20] sm:$0xff]  ;;  %v4251_v35 = vld [vmem:[%s5718_s7 + $0x28] sm:$0xff]  ;;  %v4252_v37 = vld [vmem:[%s5718_s7 + $0x30] sm:$0xff] }
 0x4ed   :  { %v1299_v55 = vmul.f32 %v5239_v62, %v1291_v52  ;;  %v1285_v56 = vsub.f32 2.0, %v1277_v53  ;;  %4543 = vmatprep.mubr.msk.f32.mxu1 %vm4920_vm2, %v4919_v16  ;;  %4546 = vmatprep.subr.mxu0 %v4919_v16  ;;  %v4253_v38 = vld [vmem:[%s5718_s7 + $0x38] sm:$0xff] }
 0x4ee   :  { %4544 = vmatmul.mubr.msk.f32.vlgmr.msra.gmra.mrb[14].mxu1 %vm575_vm7, %v1300_v54  ;;  %4733 = vmatprep.subr.bf16.mxu1 %v4732_v3  ;;  %v4768_v39 = vpack.c.bf16 %v4253_v38, %v4252_v37 }
 0x4ef   :  { %v1293_v58 = vmul.f32 %v4854_v49, %v1285_v56  ;;  %4539 = vmatmul.mubr.msk.f32.vlgmr.msra.gmra.mrb[20].mxu0 %vm575_vm7, %v1299_v55  ;;  %4735 = vmatpush3.bf16.msra.mxu1 %v4732_v3 }
 0x4f0   :  { %4547 = vmatpush3.msra.mxu0 %v1835_v57  ;;  %4548 = vmatprep.mubr.msk.f32.mxu0 %vm4920_vm2, %v4919_v16 }
 0x4f1   :  { %v1301_v59 = vmul.f32 %v5245_v1, %v1293_v58  ;;  %v1944_v1 = vld [vmem:[%s5720_s9 + $0x10] sm:$0xff]  ;;  %4741 = vmatprep.subr.bf16.mxu0 %v4740_v33 }
 0x4f2   :  { %v4736_v5 = vpack.c.bf16 %v1945_v4, %v1944_v1 }
 0x4f3   :  { %4549 = vmatmul.mubr.msk.f32.vlgmr.msra.gmra.mrb[22].mxu0 %vm575_vm7, %v1301_v59 }
 0x4f4   :  { %4737 = vmatprep.subr.bf16.mxu1 %v4736_v5  ;;  %4743 = vmatpush3.bf16.msra.mxu0 %v4740_v33 }
 0x4f5   :  { %4739 = vmatpush3.bf16.msra.mxu1 %v4736_v5  ;;  %4745 = vmatprep.subr.bf16.mxu0 %v4744_v36 }
 0x4f6   :  { %4749 = vmatprep.subr.bf16.mxu1 %v4748_v40 }
 0x4f8   :  { %4747 = vmatpush3.bf16.msra.mxu0 %v4744_v36  ;;  %v4764_v36 = vpack.c.bf16 %v4251_v35, %v4250_v34 }
 0x4fa   :  { %4765 = vmatprep.subr.bf16.mxu0 %v4764_v36 }
 0x560   :  { %v1450_v60 = vpop.f32.mrb[16].mxu0 }
 0x561   :  { %v4520_v61 = vpop.f32.mrb[17].mxu0 }
 0x564   :  { %v1374_v62 = vpop.f32.mrb[8].mxu1 }
 0x565   :  { %v4515_v63 = vpop.f32.mrb[9].mxu1 }
 0x5b9   :  { %v1526_v6 = vpop.f32.mrb[10].mxu1 }
 0x5ba   :  { %v4525_v7 = vpop.f32.mrb[11].mxu1  ;;  %1912 = vrot.lane.b32.xlu0 %v1526_v6, %s4927_s4 }
 0x5bd   :  { %v1678_v8 = vpop.f32.mrb[12].mxu1 }
 0x5be   :  { %v1602_v9 = vpop.f32.mrb[18].mxu0  ;;  %1920 = vrot.lane.b32.xlu0 %v1678_v8, %s4928_s25  ;;  %v4535_v10 = vpop.f32.mrb[13].mxu1 }
 0x5bf   :  { %1914 = vrot.lane.b32.xlu1 %v1602_v9, %s4927_s4  ;;  %v4530_v11 = vpop.f32.mrb[19].mxu0 }
 0x5c1   :  { %v1830_v12 = vpop.f32.mrb[14].mxu1 }
 0x5c2   :  { %v1754_v13 = vpop.f32.mrb[20].mxu0  ;;  %1928 = vrot.lane.b32.xlu0 %v1830_v12, %s4929_s3  ;;  %v4545_v14 = vpop.f32.mrb[15].mxu1 }
 0x5c3   :  { %1922 = vrot.lane.b32.xlu1 %v1754_v13, %s4928_s25  ;;  %v4540_v43 = vpop.f32.mrb[21].mxu0 }
 0x5c4   :  { %v4240_v43 = vld [vmem:[%s5726_s15] ss:$0 sm:$0xff] }
 0x5c6   :  { %v1906_v15 = vpop.f32.mrb[22].mxu0 }
 0x5c7   :  { %1930 = vrot.lane.b32.xlu1 %v1906_v15, %s4929_s3  ;;  %v4550_v17 = vpop.f32.mrb[23].mxu0 }
 0x62c   :  { %v1913_v42 = vpop.permute.xlu0 %1912 }
 0x62d   :  { %v1934_v20 = vsel %vm575_vm7, %v1374_v62, %v1913_v42  ;;  %v4241_v42 = vld [vmem:[%s5727_s16] ss:$0 sm:$0xff] }
 0x630   :  { %v1921_v18 = vpop.permute.xlu0 %1920 }
 0x631   :  { %v1915_v19 = vpop.permute.xlu1 %1914  ;;  %v1937_v21 = vsel %vm1936_vm8, %v1934_v20, %v1921_v18 }
 0x632   :  { %v1935_v25 = vsel %vm575_vm7, %v1450_v60, %v1915_v19 }
 0x634   :  { %v1929_v22 = vpop.permute.xlu0 %1928 }
 0x635   :  { %v1923_v23 = vpop.permute.xlu1 %1922  ;;  %v1940_v24 = vsel %vm1939_vm9, %v1937_v21, %v1929_v22  ;;  %v2183_v22 = vld [vmem:[%s5724_s13 + $0x30] sm:$0xff] }
 0x636   :  { %4559 = vmatprep.mubr.msk.f32.mxu1 %vm477_vm6, %v1940_v24  ;;  %v1938_v26 = vsel %vm1936_vm8, %v1935_v25, %v1923_v23  ;;  %v2184_v23 = vld [vmem:[%s5724_s13 + $0x38] sm:$0xff]  ;;  %v4242_v25 = vld [vmem:[%s5723_s12] ss:$0 sm:$0xff] }
 0x637   :  { %v4760_v24 = vpack.c.bf16 %v2184_v23, %v2183_v22 }
 0x639   :  { %v1931_v27 = vpop.permute.xlu1 %1930 }
 0x63a   :  { %v1941_v28 = vsel %vm1939_vm9, %v1938_v26, %v1931_v27 }
 0x63b   :  { %4560 = vmatmul.mubr.msk.f32.vlgmr.msra.gmra.mrb[16].mxu1 %vm477_vm6, %v1941_v28 }
 0x63c   :  { %4751 = vmatpush3.bf16.msra.mxu1 %v4748_v40  ;;  %v4245_v40 = vld [vmem:[%s5725_s14] ss:$0 sm:$0xff] }
 0x63d   :  { %4753 = vmatprep.subr.bf16.mxu1 %v4752_v44 }
 0x640   :  { %4755 = vmatpush3.bf16.msra.mxu1 %v4752_v44 }
 0x641   :  { %4757 = vmatprep.subr.bf16.mxu1 %v4756_v47 }
 0x644   :  { %4759 = vmatpush3.bf16.msra.mxu1 %v4756_v47 }
 0x645   :  { %4761 = vmatprep.subr.bf16.mxu1 %v4760_v24 }
 0x648   :  { %4763 = vmatpush3.bf16.msra.mxu1 %v4760_v24 }
 0x649   :  { %4613 = vmatprep.subr.mxu1 %v4919_v16 }
 0x70e   :  { %v4561_v49 = vpop.f32.mrb[16].mxu1 }
 0x70f   :  { %v2031_v50 = vadd.f32 %v4561_v49, %v4237_v48  ;;  %v2025_v51 = vpop.f32.mrb[17].mxu1 }
 0x710   :  { %v2026_v52 = vadd.f32 %v4237_v48, %v2025_v51 }
 0x711   :  { %v2035_v53 = vadd.f32 %v2031_v50, %v5094_v32 }
 0x712   :  { %v2034_v54 = vadd.f32 %v2026_v52, %v5090_v30 }
 0x713   :  { %v2039_v55 = vsel %vm477_vm6, %v2035_v53, 0.0 }
 0x714   :  { %v2038_v56 = vsel %vm477_vm6, %v2034_v54, 0.0 }
 0x715   :  { %v2040_v57 = vadd.f32 %v2039_v55, %v2038_v56 }
 0x717   :  { %v2041_v58 = vrot.slane %v2040_v57, 4 }
 0x719   :  { %v2042_v59 = vadd.f32 %v2041_v58, %v2040_v57 }
 0x71b   :  { %v2043_v60 = vrot.slane %v2042_v59, 2 }
 0x71d   :  { %v2044_v61 = vadd.f32 %v2043_v60, %v2042_v59 }
 0x71f   :  { %v2045_v62 = vrot.slane %v2044_v61, 1 }
 0x721   :  { %v2046_v63 = vadd.f32 %v2045_v62, %v2044_v61 }
 0x723   :  { %v2048_v0 = vmul.f32 0.0625, %v2046_v63 }
 0x725   :  { %v2049_v2 = vsub.f32 %v2034_v54, %v2048_v0  ;;  %v2050_v3 = vsub.f32 %v2035_v53, %v2048_v0 }
 0x727   :  { %v2051_v1 = vmul.f32 %v2049_v2, %v2049_v2  ;;  %v2052_v4 = vmul.f32 %v2050_v3, %v2050_v3 }
 0x729   :  { %v2053_v32 = vsel %vm477_vm6, %v2051_v1, 0.0  ;;  %v2054_v30 = vsel %vm477_vm6, %v2052_v4, 0.0 }
 0x72a   :  { %v2055_v5 = vadd.f32 %v2054_v30, %v2053_v32 }
 0x72c   :  { %v2056_v6 = vrot.slane %v2055_v5, 4 }
 0x72e   :  { %v2057_v7 = vadd.f32 %v2056_v6, %v2055_v5 }
 0x730   :  { %v2058_v8 = vrot.slane %v2057_v7, 2 }
 0x732   :  { %v2059_v9 = vadd.f32 %v2058_v8, %v2057_v7 }
 0x734   :  { %v2060_v10 = vrot.slane %v2059_v9, 1 }
 0x736   :  { %v2061_v11 = vadd.f32 %v2060_v10, %v2059_v9  ;;  %v4248_v9 = vld [vmem:[%s5728_s17] ss:$0 sm:$0xff] }
 0x738   :  { %v2062_v12 = vmul.f32 0.0625, %v2061_v11 }
 0x73a   :  { %v2063_v13 = vadd.f32 1e-05, %v2062_v12  ;;  %v4249_v12 = vld [vmem:[%s5729_s18] ss:$0 sm:$0xff] }
 0x73c   :  { %4855 = vrsqrt.f32 %v2063_v13 }
 0x746   :  { %v4856_v14 = vpop.eup %4855 }
 0x747   :  { %v2065_v15 = vmul.f32 %v4856_v14, %v2049_v2  ;;  %v2066_v17 = vmul.f32 %v4856_v14, %v2050_v3 }
 0x749   :  { %v2073_v18 = vmul.f32 %v4240_v43, %v2065_v15  ;;  %v2074_v19 = vmul.f32 %v4240_v43, %v2066_v17  ;;  %v4255_v17 = vld [vmem:[%s5719_s8 + $0x1] ss:$0 sm:$0xff]  ;;  %s4191_s8 = sshll.u32 %s4930_s22, 4  ;;  %s4192_s8 = int_to_ptr.vmem [resolvable:$true] %s4191_s8 }
 0x74a   :  { %p4900_p1 = scmp.lt.s32.totalorder %s4192_s8, %s4192_s8 }
 0x74b   :  { %v2081_v20 = vadd.f32 %v4241_v42, %v2073_v18  ;;  %v2082_v21 = vadd.f32 %v4241_v42, %v2074_v19 }
 0x74d   :  { %4570 = vmatprep.mubr.msk.f32.mxu0 %vm477_vm6, %v2081_v20 }
 0x74e   :  { %4571 = vmatmul.mubr.msk.f32.vlgmr.msra.gmra.mrb[24].mxu0 %vm477_vm6, %v2082_v21 }
 0x74f   :  { %4767 = vmatpush3.bf16.msra.mxu0 %v4764_v36 }
 0x750   :  { %4769 = vmatprep.subr.bf16.mxu0 %v4768_v39 }
 0x753   :  { %4771 = vmatpush3.bf16.msra.mxu0 %v4768_v39 }
 0x754   :  { %4603 = vmatprep.subr.mxu0 %v4919_v16 }
 0x821   :  { %v4572_v26 = vpop.f32.mrb[24].mxu0 }
 0x822   :  { %v2172_v27 = vadd.f32 %v4572_v26, %v4242_v25  ;;  %v2166_v28 = vpop.f32.mrb[25].mxu0 }
 0x823   :  { %v2167_v29 = vadd.f32 %v4242_v25, %v2166_v28 }
 0x824   :  { %v2176_v33 = vmax.f32 %v2172_v27, 0.0 }
 0x825   :  { %v2175_v31 = vmax.f32 %v2167_v29, 0.0 }
 0x827   :  { %4589 = vmatprep.mubr.msk.f32.mxu1 %vm2192_vm10, %v2175_v31 }
 0x828   :  { %4590 = vmatmul.mubr.msk.f32.vlgmr.msra.gmra.mrb[18].mxu1 %vm2192_vm10, %v2176_v33 }
 0x829   :  { %4615 = vmatprep.mubr.msk.f32.mxu1 %vm4920_vm2, %v4919_v16 }
 0x8fb   :  { %v4591_v41 = vpop.f32.mrb[18].mxu1 }
 0x8fc   :  { %v2271_v44 = vadd.f32 %v4591_v41, %v4245_v40  ;;  %v2265_v45 = vpop.f32.mrb[19].mxu1 }
 0x8fd   :  { %v2266_v46 = vadd.f32 %v4245_v40, %v2265_v45 }
 0x8fe   :  { %v2275_v47 = vadd.f32 %v2271_v44, %v2082_v21 }
 0x8ff   :  { %v2274_v48 = vadd.f32 %v2266_v46, %v2081_v20 }
 0x900   :  { %v2279_v49 = vsel %vm477_vm6, %v2275_v47, 0.0 }
 0x901   :  { %v2278_v50 = vsel %vm477_vm6, %v2274_v48, 0.0 }
 0x902   :  { %v2280_v51 = vadd.f32 %v2279_v49, %v2278_v50 }
 0x904   :  { %v2281_v52 = vrot.slane %v2280_v51, 4 }
 0x906   :  { %v2282_v53 = vadd.f32 %v2281_v52, %v2280_v51 }
 0x908   :  { %v2283_v54 = vrot.slane %v2282_v53, 2 }
 0x90a   :  { %v2284_v55 = vadd.f32 %v2283_v54, %v2282_v53 }
 0x90c   :  { %v2285_v56 = vrot.slane %v2284_v55, 1 }
 0x90e   :  { %v2286_v57 = vadd.f32 %v2285_v56, %v2284_v55 }
 0x910   :  { %v2287_v58 = vmul.f32 0.0625, %v2286_v57 }
 0x912   :  { %v2288_v59 = vsub.f32 %v2274_v48, %v2287_v58  ;;  %v2289_v60 = vsub.f32 %v2275_v47, %v2287_v58 }
 0x914   :  { %v2290_v61 = vmul.f32 %v2288_v59, %v2288_v59  ;;  %v2291_v62 = vmul.f32 %v2289_v60, %v2289_v60 }
 0x916   :  { %v2292_v63 = vsel %vm477_vm6, %v2290_v61, 0.0  ;;  %v2293_v0 = vsel %vm477_vm6, %v2291_v62, 0.0 }
 0x917   :  { %v2294_v2 = vadd.f32 %v2293_v0, %v2292_v63 }
 0x919   :  { %v2295_v3 = vrot.slane %v2294_v2, 4 }
 0x91b   :  { %v2296_v1 = vadd.f32 %v2295_v3, %v2294_v2 }
 0x91d   :  { %v2297_v4 = vrot.slane %v2296_v1, 2 }
 0x91f   :  { %v2298_v32 = vadd.f32 %v2297_v4, %v2296_v1 }
 0x921   :  { %v2299_v30 = vrot.slane %v2298_v32, 1 }
 0x923   :  { %v2300_v5 = vadd.f32 %v2299_v30, %v2298_v32 }
 0x925   :  { %v2301_v6 = vmul.f32 0.0625, %v2300_v5 }
 0x927   :  { %v2302_v7 = vadd.f32 1e-05, %v2301_v6 }
 0x929   :  { %4857 = vrsqrt.f32 %v2302_v7 }
 0x933   :  { %v4858_v8 = vpop.eup %4857 }
 0x934   :  { %v2304_v10 = vmul.f32 %v4858_v8, %v2288_v59  ;;  %v2305_v11 = vmul.f32 %v4858_v8, %v2289_v60 }
 0x936   :  { %v2312_v13 = vmul.f32 %v4248_v9, %v2304_v10  ;;  %v2313_v14 = vmul.f32 %v4248_v9, %v2305_v11 }
 0x938   :  { %v5401_v43 = vadd.f32 %v4249_v12, %v2312_v13  ;;  %v5403_v15 = vadd.f32 %v4249_v12, %v2313_v14 }
 0x93a   :  { %4600 = vmatprep.mubr.msk.f32.mxu0 %vm477_vm6, %v5401_v43 }
 0x93b   :  { %4601 = vmatmul.mubr.msk.f32.vlgmr.msra.gmra.mrb[26].mxu0 %vm477_vm6, %v5403_v15 }
 0x93c   :  { %4605 = vmatprep.mubr.msk.f32.mxu0 %vm4920_vm2, %v4919_v16 }
 0xa0e   :  { %v4602_v42 = vpop.f32.mrb[26].mxu0 }
 0xa0f   :  { %v5414_v18 = vadd.f32 %v4602_v42, %v4255_v17  ;;  %v2407_v19 = vpop.f32.mrb[27].mxu0 }
 0xa10   :  { %v5416_v20 = vadd.f32 %v4255_v17, %v2407_v19 }
 0xa11   :  { %2420 = vrot.lane.b32.xlu1 %v5414_v18, %s4923_s5 }
 0xa12   :  { %2418 = vrot.lane.b32.xlu0 %v5416_v20, %s4923_s5 }
 0xa15   :  { %2424 = vrot.lane.b32.xlu1 %v5414_v18, %s4922_s27 }
 0xa16   :  { %2422 = vrot.lane.b32.xlu0 %v5416_v20, %s4922_s27  ;;  %s4895_s27 = scalar_lea.vmem %s4192_s8, 256 }
 0xa17   :  { %p4896_p0 = scmp.ne.s32.totalorder %s4192_s8, %s4895_s27  ;;  %p4901_p2 = scmp.lt.s32.totalorder %s4895_s27, %s4895_s27 }
 0xa19   :  { %2428 = vrot.lane.b32.xlu1 %v5414_v18, %s4924_s28  ;;  %p4902_p3 = por %p4901_p2, %p4900_p1 }
 0xa1a   :  { %2426 = vrot.lane.b32.xlu0 %v5416_v20, %s4924_s28 }
 0xa1b   :  { %p4903_p4 = pnand %p4902_p3, %p4896_p0 }
 0xa1d   :  { %2506 = vrot.lane.b32.xlu1 %v5414_v18, %s4925_s29 }
 0xa1e   :  { %2430 = vrot.lane.b32.xlu0 %v5416_v20, %s4925_s29 }
 0xa83   :  { %v5434_v21 = vpop.permute.xlu1 %2420 }
 0xa84   :  { %2658 = vrot.lane.b32.xlu1 %v5434_v21, %s4925_s29  ;;  %v5438_v22 = vpop.permute.xlu0 %2418 }
 0xa85   :  { %2582 = vrot.lane.b32.xlu0 %v5438_v22, %s4925_s29 }
 0xa87   :  { %v5442_v23 = vpop.permute.xlu1 %2424 }
 0xa88   :  { %2810 = vrot.lane.b32.xlu1 %v5442_v23, %s4925_s29  ;;  %v5446_v24 = vpop.permute.xlu0 %2422 }
 0xa89   :  { %2734 = vrot.lane.b32.xlu0 %v5446_v24, %s4925_s29 }
 0xa8b   :  { %v5450_v25 = vpop.permute.xlu1 %2428 }
 0xa8c   :  { %2962 = vrot.lane.b32.xlu1 %v5450_v25, %s4925_s29  ;;  %v5454_v26 = vpop.permute.xlu0 %2426 }
 0xa8d   :  { %2886 = vrot.lane.b32.xlu0 %v5454_v26, %s4925_s29 }
 0xa8f   :  { %v2507_v28 = vpop.permute.xlu1 %2506 }
 0xa90   :  { %v2431_v27 = vpop.permute.xlu0 %2430 }
 0xa91   :  { %4604 = vmatpush3.xpose.msk.msra.mxu0 %vm575_vm7, %v2431_v27 }
 0xa92   :  { %4608 = vmatprep.subr.mxu0 %v4919_v16 }
 0xa94   :  { %4606 = vmatmul.mubr.msk.f32.vlgmr.msra.gmra.mrb[28].mxu0 %vm575_vm7, %v5416_v20 }
 0xa95   :  { %4609 = vmatpush3.xpose.msk.msra.mxu0 %vm575_vm7, %v2507_v28  ;;  %4610 = vmatprep.mubr.msk.f32.mxu0 %vm4920_vm2, %v4919_v16 }
 0xa96   :  { %4618 = vmatprep.subr.mxu0 %v4919_v16 }
 0xa98   :  { %4611 = vmatmul.mubr.msk.f32.vlgmr.msra.gmra.mrb[30].mxu0 %vm575_vm7, %v5414_v18 }
 0xa99   :  { %4620 = vmatprep.mubr.msk.f32.mxu0 %vm4920_vm2, %v4919_v16 }
 0xaf6   :  { %v2659_v29 = vpop.permute.xlu1 %2658 }
 0xaf7   :  { %4619 = vmatpush3.xpose.msk.msra.mxu0 %vm575_vm7, %v2659_v29  ;;  %v2583_v31 = vpop.permute.xlu0 %2582 }
 0xaf8   :  { %4614 = vmatpush3.xpose.msk.msra.mxu1 %vm575_vm7, %v2583_v31  ;;  %4628 = vmatprep.subr.mxu0 %v4919_v16 }
 0xaf9   :  { %4623 = vmatprep.subr.mxu1 %v4919_v16 }
 0xafa   :  { %v2811_v33 = vpop.permute.xlu1 %2810  ;;  %4621 = vmatmul.mubr.msk.f32.vlgmr.msra.gmra.mrb[32].mxu0 %vm575_vm7, %v5434_v21 }
 0xafb   :  { %4616 = vmatmul.mubr.msk.f32.vlgmr.msra.gmra.mrb[20].mxu1 %vm575_vm7, %v5438_v22  ;;  %4629 = vmatpush3.xpose.msk.msra.mxu0 %vm575_vm7, %v2811_v33  ;;  %v2735_v34 = vpop.permute.xlu0 %2734 }
 0xafc   :  { %4624 = vmatpush3.xpose.msk.msra.mxu1 %vm575_vm7, %v2735_v34  ;;  %4630 = vmatprep.mubr.msk.f32.mxu0 %vm4920_vm2, %v4919_v16 }
 0xafd   :  { %4625 = vmatprep.mubr.msk.f32.mxu1 %vm4920_vm2, %v4919_v16  ;;  %4638 = vmatprep.subr.mxu0 %v4919_v16 }
 0xafe   :  { %v2963_v35 = vpop.permute.xlu1 %2962  ;;  %4631 = vmatmul.mubr.msk.f32.vlgmr.msra.gmra.mrb[34].mxu0 %vm575_vm7, %v5442_v23  ;;  %4633 = vmatprep.subr.mxu1 %v4919_v16 }
 0xaff   :  { %4626 = vmatmul.mubr.msk.f32.vlgmr.msra.gmra.mrb[22].mxu1 %vm575_vm7, %v5446_v24  ;;  %4639 = vmatpush3.xpose.msk.msra.mxu0 %vm575_vm7, %v2963_v35  ;;  %v2887_v36 = vpop.permute.xlu0 %2886 }
 0xb00   :  { %4634 = vmatpush3.xpose.msk.msra.mxu1 %vm575_vm7, %v2887_v36  ;;  %4640 = vmatprep.mubr.msk.f32.mxu0 %vm4920_vm2, %v4919_v16 }
 0xb01   :  { %4635 = vmatprep.mubr.msk.f32.mxu1 %vm4920_vm2, %v4919_v16  ;;  %4643 = vmatprep.subr.mxu1 %v4919_v16 }
 0xb02   :  { %4641 = vmatmul.mubr.msk.f32.vlgmr.msra.gmra.mrb[36].mxu0 %vm575_vm7, %v5450_v25  ;;  %4648 = vmatprep.subr.mxu0 %v4919_v16 }
 0xb03   :  { %4636 = vmatmul.mubr.msk.f32.vlgmr.msra.gmra.mrb[24].mxu1 %vm575_vm7, %v5454_v26  ;;  %4650 = vmatprep.mubr.msk.f32.mxu0 %vm4920_vm2, %v4919_v16 }
 0xb04   :  { %4645 = vmatprep.mubr.msk.f32.mxu1 %vm4920_vm2, %v4919_v16 }
 0xb67   :  { %v2502_v37 = vpop.f32.mrb[28].mxu0 }
 0xb68   :  { %v3038_v38 = vmul.f32 0.35355338, %v2502_v37  ;;  %v4607_v39 = vpop.f32.mrb[29].mxu0 }
 0xb6a   :  { %v3046_v40 = vsel %vm575_vm7, %v3038_v38, -inf }
 0xb6b   :  { %3047 = vmax.xlane.f32.xlu0 %v3046_v40  ;;  %v2578_v41 = vpop.f32.mrb[30].mxu0 }
 0xb6c   :  { %v3039_v44 = vmul.f32 0.35355338, %v2578_v41  ;;  %v4612_v45 = vpop.f32.mrb[31].mxu0 }
 0xb6e   :  { %v3049_v46 = vsel %vm575_vm7, %v3039_v44, -inf }
 0xb6f   :  { %3050 = vmax.xlane.f32.xlu1 %v3049_v46 }
 0xbcd   :  { %v2730_v47 = vpop.f32.mrb[32].mxu0 }
 0xbce   :  { %v2654_v48 = vpop.f32.mrb[20].mxu1  ;;  %v4622_v49 = vpop.f32.mrb[33].mxu0  ;;  %v3041_v52 = vmul.f32 0.35355338, %v2730_v47 }
 0xbcf   :  { %v3040_v50 = vmul.f32 0.35355338, %v2654_v48  ;;  %v4617_v51 = vpop.f32.mrb[21].mxu1 }
 0xbd0   :  { %v3055_v61 = vsel %vm575_vm7, %v3041_v52, -inf }
 0xbd1   :  { %v2882_v53 = vpop.f32.mrb[34].mxu0  ;;  %v3052_v54 = vsel %vm575_vm7, %v3040_v50, -inf }
 0xbd2   :  { %v4632_v55 = vpop.f32.mrb[35].mxu0  ;;  %3053 = vmax.xlane.f32.xlu0 %v3052_v54  ;;  %v2806_v56 = vpop.f32.mrb[22].mxu1  ;;  %v3043_v59 = vmul.f32 0.35355338, %v2882_v53 }
 0xbd3   :  { %v3042_v57 = vmul.f32 0.35355338, %v2806_v56  ;;  %v4627_v58 = vpop.f32.mrb[23].mxu1 }
 0xbd4   :  { %v3061_v4 = vsel %vm575_vm7, %v3043_v59, -inf }
 0xbd5   :  { %v3034_v60 = vpop.f32.mrb[36].mxu0  ;;  %v3058_v62 = vsel %vm575_vm7, %v3042_v57, -inf }
 0xbd6   :  { %v4642_v63 = vpop.f32.mrb[37].mxu0  ;;  %3056 = vmax.xlane.f32.xlu0 %v3055_v61  ;;  %3059 = vmax.xlane.f32.xlu1 %v3058_v62  ;;  %v2958_v0 = vpop.f32.mrb[24].mxu1  ;;  %v3045_v1 = vmul.f32 0.35355338, %v3034_v60 }
 0xbd7   :  { %v3044_v2 = vmul.f32 0.35355338, %v2958_v0  ;;  %v4637_v3 = vpop.f32.mrb[25].mxu1 }
 0xbd8   :  { %v3067_v30 = vsel %vm575_vm7, %v3045_v1, -inf }
 0xbd9   :  { %v3064_v32 = vsel %vm575_vm7, %v3044_v2, -inf }
 0xbda   :  { %3062 = vmax.xlane.f32.xlu0 %v3061_v4  ;;  %3065 = vmax.xlane.f32.xlu1 %v3064_v32 }
 0xbde   :  { %3068 = vmax.xlane.f32.xlu0 %v3067_v30 }
 0xbeb   :  { %3158 = vrot.lane.b32.xlu1 %v5416_v20, %s4926_s0 }
 0xbef   :  { %3310 = vrot.lane.b32.xlu1 %v5438_v22, %s4926_s0 }
 0xbf3   :  { %3386 = vrot.lane.b32.xlu1 %v5434_v21, %s4926_s0 }
 0xbf4   :  { %3234 = vrot.lane.b32.xlu0 %v5414_v18, %s4926_s0 }
 0xbf7   :  { %3538 = vrot.lane.b32.xlu1 %v5442_v23, %s4926_s0 }
 0xbf8   :  { %3462 = vrot.lane.b32.xlu0 %v5446_v24, %s4926_s0  ;;  %v3048_v7 = vpop.xlane.xlu0 %3047 }
 0xbf9   :  { %v3070_v8 = vsub.f32 %v3038_v38, %v3048_v7 }
 0xbfb   :  { %v3078_v10 = vmul.f32 1.442695, %v3070_v8 }
 0xbfc   :  { %v3051_v5 = vpop.xlane.xlu1 %3050 }
 0xbfd   :  { %v3071_v6 = vsub.f32 %v3039_v44, %v3051_v5 }
 0xbff   :  { %v3080_v9 = vmul.f32 1.442695, %v3071_v6 }
 0xc01   :  { %4859 = vpow2.f32 %v3080_v9 }
 0xc02   :  { %4861 = vpow2.f32 %v3078_v10 }
 0xc0b   :  { %v5526_v11 = vpop.eup %4859 }
 0xc0c   :  { %v3097_v12 = vsel %vm575_vm7, %v5526_v11, 0.0  ;;  %v5530_v13 = vpop.eup %4861 }
 0xc0d   :  { %v3094_v14 = vsel %vm575_vm7, %v5530_v13, 0.0 }
 0xc17   :  { %3098 = vadd.xlane.f32.xlu0 %v3097_v12 }
 0xc1b   :  { %3095 = vadd.xlane.f32.xlu1 %v3094_v14 }
 0xc5f   :  { %v3054_v17 = vpop.xlane.xlu0 %3053 }
 0xc60   :  { %v3072_v42 = vsub.f32 %v3040_v50, %v3054_v17 }
 0xc62   :  { %v3082_v18 = vmul.f32 1.442695, %v3072_v42 }
 0xc63   :  { %v3060_v19 = vpop.xlane.xlu1 %3059  ;;  %v3057_v20 = vpop.xlane.xlu0 %3056 }
 0xc64   :  { %4863 = vpow2.f32 %v3082_v18  ;;  %v3074_v21 = vsub.f32 %v3042_v57, %v3060_v19  ;;  %v3073_v22 = vsub.f32 %v3041_v52, %v3057_v20 }
 0xc66   :  { %v3086_v23 = vmul.f32 1.442695, %v3074_v21  ;;  %v3084_v24 = vmul.f32 1.442695, %v3073_v22 }
 0xc67   :  { %v3066_v27 = vpop.xlane.xlu1 %3065  ;;  %v3063_v28 = vpop.xlane.xlu0 %3062 }
 0xc68   :  { %4865 = vpow2.f32 %v3086_v23  ;;  %v3076_v29 = vsub.f32 %v3044_v2, %v3066_v27  ;;  %v3075_v31 = vsub.f32 %v3043_v59, %v3063_v28 }
 0xc69   :  { %4867 = vpow2.f32 %v3084_v24 }
 0xc6a   :  { %v3090_v33 = vmul.f32 1.442695, %v3076_v29  ;;  %v3088_v34 = vmul.f32 1.442695, %v3075_v31 }
 0xc6b   :  { %v3159_v35 = vpop.permute.xlu1 %3158  ;;  %v3069_v36 = vpop.xlane.xlu0 %3068 }
 0xc6c   :  { %4869 = vpow2.f32 %v3090_v33  ;;  %v3077_v37 = vsub.f32 %v3045_v1, %v3069_v36  ;;  %4644 = vmatpush3.msra.mxu1 %v3159_v35 }
 0xc6d   :  { %4871 = vpow2.f32 %v3088_v34  ;;  %4653 = vmatprep.subr.mxu1 %v4919_v16 }
 0xc6e   :  { %v5535_v38 = vpop.eup %4863  ;;  %v3092_v39 = vmul.f32 1.442695, %v3077_v37 }
 0xc6f   :  { %v3235_v40 = vpop.permute.xlu0 %3234  ;;  %v3100_v41 = vsel %vm575_vm7, %v5535_v38, 0.0  ;;  %v3311_v54 = vpop.permute.xlu1 %3310 }
 0xc70   :  { %4873 = vpow2.f32 %v3092_v39  ;;  %3101 = vadd.xlane.f32.xlu1 %v3100_v41  ;;  %4649 = vmatpush3.msra.mxu0 %v3235_v40 }
 0xc71   :  { %4658 = vmatprep.subr.mxu0 %v4919_v16 }
 0xc72   :  { %v5540_v44 = vpop.eup %4865 }
 0xc73   :  { %v5542_v45 = vpop.eup %4867  ;;  %v3106_v46 = vsel %vm575_vm7, %v5540_v44, 0.0  ;;  %v3387_v55 = vpop.permute.xlu1 %3386 }
 0xc74   :  { %3107 = vadd.xlane.f32.xlu1 %v3106_v46  ;;  %v3103_v47 = vsel %vm575_vm7, %v5542_v45, 0.0  ;;  %v3463_v56 = vpop.permute.xlu0 %3462 }
 0xc75   :  { %3104 = vadd.xlane.f32.xlu0 %v3103_v47 }
 0xc76   :  { %v5548_v48 = vpop.eup %4869 }
 0xc77   :  { %v5550_v49 = vpop.eup %4871  ;;  %v3112_v50 = vsel %vm575_vm7, %v5548_v48, 0.0  ;;  %v5564_v57 = vpop.permute.xlu1 %3538 }
 0xc78   :  { %3113 = vadd.xlane.f32.xlu1 %v3112_v50  ;;  %v3109_v51 = vsel %vm575_vm7, %v5550_v49, 0.0 }
 0xc79   :  { %3110 = vadd.xlane.f32.xlu0 %v3109_v51  ;;  %v4282_v51 = vld [vmem:[%s5720_s9 + $0x20] sm:$0xff] }
 0xc7a   :  { %v5556_v52 = vpop.eup %4873 }
 0xc7b   :  { %v3115_v53 = vsel %vm575_vm7, %v5556_v52, 0.0 }
 0xc7d   :  { %3116 = vadd.xlane.f32.xlu0 %v3115_v53  ;;  %v4283_v53 = vld [vmem:[%s5720_s9 + $0x28] sm:$0xff] }
 0xc89   :  { %3690 = vrot.lane.b32.xlu1 %v5450_v25, %s4926_s0 }
 0xc93   :  { %3614 = vrot.lane.b32.xlu0 %v5454_v26, %s4926_s0 }
 0xca4   :  { %v3099_v58 = vpop.xlane.xlu0 %3098 }
 0xca5   :  { %4875 = vrcp.f32 %v3099_v58 }
 0xca8   :  { %v3096_v59 = vpop.xlane.xlu1 %3095 }
 0xca9   :  { %4877 = vrcp.f32 %v3096_v59 }
 0xcaf   :  { %v4876_v60 = vpop.eup %4875 }
 0xcb0   :  { %v3127_v61 = vmul.f32 %v4876_v60, %v3099_v58 }
 0xcb2   :  { %v3135_v62 = vsub.f32 2.0, %v3127_v61 }
 0xcb3   :  { %v4878_v63 = vpop.eup %4877 }
 0xcb4   :  { %v3143_v0 = vmul.f32 %v4876_v60, %v3135_v62  ;;  %v3126_v2 = vmul.f32 %v4878_v63, %v3096_v59 }
 0xcb6   :  { %v3151_v25 = vmul.f32 %v5526_v11, %v3143_v0  ;;  %v3134_v3 = vsub.f32 2.0, %v3126_v2 }
 0xcb8   :  { %v3142_v1 = vmul.f32 %v4878_v63, %v3134_v3  ;;  %4651 = vmatmul.mubr.msk.f32.vlgmr.msra.gmra.mrb[38].mxu0 %vm575_vm7, %v3151_v25 }
 0xcb9   :  { %4659 = vmatpush3.msra.mxu0 %v3387_v55  ;;  %4660 = vmatprep.mubr.msk.f32.mxu0 %vm4920_vm2, %v4919_v16 }
 0xcba   :  { %v3150_v26 = vmul.f32 %v5530_v13, %v3142_v1  ;;  %4668 = vmatprep.subr.mxu0 %v4919_v16 }
 0xcbc   :  { %4646 = vmatmul.mubr.msk.f32.vlgmr.msra.gmra.mrb[26].mxu1 %vm575_vm7, %v3150_v26 }
 0xcbd   :  { %4654 = vmatpush3.msra.mxu1 %v3311_v54  ;;  %4655 = vmatprep.mubr.msk.f32.mxu1 %vm4920_vm2, %v4919_v16  ;;  %v4772_v54 = vpack.c.bf16 %v4283_v53, %v4282_v51 }
 0xcbe   :  { %4663 = vmatprep.subr.mxu1 %v4919_v16 }
 0xcfd   :  { %v3102_v4 = vpop.xlane.xlu1 %3101 }
 0xcfe   :  { %4879 = vrcp.f32 %v3102_v4 }
 0xd01   :  { %v3108_v32 = vpop.xlane.xlu1 %3107 }
 0xd02   :  { %4881 = vrcp.f32 %v3108_v32  ;;  %v3105_v30 = vpop.xlane.xlu0 %3104 }
 0xd03   :  { %4883 = vrcp.f32 %v3105_v30 }
 0xd05   :  { %v3114_v5 = vpop.xlane.xlu1 %3113 }
 0xd06   :  { %4885 = vrcp.f32 %v3114_v5  ;;  %v3111_v6 = vpop.xlane.xlu0 %3110 }
 0xd07   :  { %4887 = vrcp.f32 %v3111_v6 }
 0xd08   :  { %v4880_v7 = vpop.eup %4879 }
 0xd09   :  { %v3128_v8 = vmul.f32 %v4880_v7, %v3102_v4 }
 0xd0a   :  { %v3117_v9 = vpop.xlane.xlu0 %3116 }
 0xd0b   :  { %v3136_v10 = vsub.f32 2.0, %v3128_v8  ;;  %4889 = vrcp.f32 %v3117_v9 }
 0xd0c   :  { %v4882_v11 = vpop.eup %4881 }
 0xd0d   :  { %v4884_v12 = vpop.eup %4883  ;;  %v3144_v13 = vmul.f32 %v4880_v7, %v3136_v10  ;;  %v3130_v14 = vmul.f32 %v4882_v11, %v3108_v32 }
 0xd0e   :  { %v3129_v17 = vmul.f32 %v4884_v12, %v3105_v30  ;;  %v3615_v36 = vpop.permute.xlu0 %3614 }
 0xd0f   :  { %v3152_v42 = vmul.f32 %v5535_v38, %v3144_v13  ;;  %v3138_v18 = vsub.f32 2.0, %v3130_v14  ;;  %v4295_v13 = vld [vmem:[%s5722_s11 + $0x28] sm:$0xff] }
 0xd10   :  { %v4886_v19 = vpop.eup %4885  ;;  %v3137_v20 = vsub.f32 2.0, %v3129_v17  ;;  %v4296_v17 = vld [vmem:[%s5722_s11 + $0x30] sm:$0xff] }
 0xd11   :  { %v4888_v21 = vpop.eup %4887  ;;  %v3146_v22 = vmul.f32 %v4882_v11, %v3138_v18  ;;  %v3132_v23 = vmul.f32 %v4886_v19, %v3114_v5  ;;  %4656 = vmatmul.mubr.msk.f32.vlgmr.msra.gmra.mrb[28].mxu1 %vm575_vm7, %v3152_v42  ;;  %v4297_v42 = vld [vmem:[%s5722_s11 + $0x38] sm:$0xff] }
 0xd12   :  { %v3145_v24 = vmul.f32 %v4884_v12, %v3137_v20  ;;  %v3131_v27 = vmul.f32 %v4888_v21, %v3111_v6  ;;  %4664 = vmatpush3.msra.mxu1 %v3463_v56  ;;  %4665 = vmatprep.mubr.msk.f32.mxu1 %vm4920_vm2, %v4919_v16  ;;  %v4294_v12 = vld [vmem:[%s5722_s11 + $0x20] sm:$0xff]  ;;  %v4784_v18 = vpack.c.bf16 %v4297_v42, %v4296_v17  ;;  %v4303_v20 = vld [vmem:[%s5724_s13 + $0x48] sm:$0xff] }
 0xd13   :  { %v3154_v28 = vmul.f32 %v5540_v44, %v3146_v22  ;;  %v3140_v29 = vsub.f32 2.0, %v3132_v23  ;;  %4673 = vmatprep.subr.mxu1 %v4919_v16  ;;  %v3691_v44 = vpop.permute.xlu1 %3690  ;;  %v4780_v14 = vpack.c.bf16 %v4295_v13, %v4294_v12  ;;  %v4305_v23 = vld [vmem:[%s5724_s13 + $0x58] sm:$0xff] }
 0xd14   :  { %v3153_v31 = vmul.f32 %v5542_v45, %v3145_v24  ;;  %v3139_v33 = vsub.f32 2.0, %v3131_v27  ;;  %v4306_v27 = vld [vmem:[%s5724_s13 + $0x60] sm:$0xff] }
 0xd15   :  { %v4890_v34 = vpop.eup %4889  ;;  %v3148_v35 = vmul.f32 %v4886_v19, %v3140_v29  ;;  %4666 = vmatmul.mubr.msk.f32.vlgmr.msra.gmra.mrb[30].mxu1 %vm575_vm7, %v3154_v28  ;;  %v4302_v19 = vld [vmem:[%s5724_s13 + $0x40] sm:$0xff]  ;;  %v4307_v28 = vld [vmem:[%s5724_s13 + $0x68] sm:$0xff] }
 0xd16   :  { %v3147_v37 = vmul.f32 %v4888_v21, %v3139_v33  ;;  %v3133_v38 = vmul.f32 %v4890_v34, %v3117_v9  ;;  %4661 = vmatmul.mubr.msk.f32.vlgmr.msra.gmra.mrb[40].mxu0 %vm575_vm7, %v3153_v31  ;;  %4674 = vmatpush3.msra.mxu1 %v3615_v36  ;;  %v4304_v21 = vld [vmem:[%s5724_s13 + $0x50] sm:$0xff]  ;;  %v4788_v22 = vpack.c.bf16 %v4303_v20, %v4302_v19  ;;  %v4287_v31 = vld [vmem:[%s5721_s10 + $0x1] ss:$0 sm:$0xff] }
 0xd17   :  { %v3156_v39 = vmul.f32 %v5548_v48, %v3148_v35  ;;  %4669 = vmatpush3.msra.mxu0 %v5564_v57  ;;  %4670 = vmatprep.mubr.msk.f32.mxu0 %vm4920_vm2, %v4919_v16  ;;  %v4792_v24 = vpack.c.bf16 %v4305_v23, %v4304_v21  ;;  %v4796_v29 = vpack.c.bf16 %v4307_v28, %v4306_v27 }
 0xd18   :  { %v3155_v40 = vmul.f32 %v5550_v49, %v3147_v37  ;;  %v3141_v41 = vsub.f32 2.0, %v3133_v38  ;;  %4675 = vmatprep.mubr.msk.f32.mxu1 %vm4920_vm2, %v4919_v16  ;;  %4678 = vmatprep.subr.mxu0 %v4919_v16 }
 0xd19   :  { %4676 = vmatmul.mubr.msk.f32.vlgmr.msra.gmra.mrb[32].mxu1 %vm575_vm7, %v3156_v39  ;;  %4773 = vmatprep.subr.bf16.mxu1 %v4772_v54 }
 0xd1a   :  { %v3149_v45 = vmul.f32 %v4890_v34, %v3141_v41  ;;  %4671 = vmatmul.mubr.msk.f32.vlgmr.msra.gmra.mrb[42].mxu0 %vm575_vm7, %v3155_v40  ;;  %4775 = vmatpush3.bf16.msra.mxu1 %v4772_v54 }
 0xd1b   :  { %4679 = vmatpush3.msra.mxu0 %v3691_v44  ;;  %4680 = vmatprep.mubr.msk.f32.mxu0 %vm4920_vm2, %v4919_v16  ;;  %v4284_v16 = vld [vmem:[%s5720_s9 + $0x30] sm:$0xff] }
 0xd1c   :  { %v3157_v46 = vmul.f32 %v5556_v52, %v3149_v45  ;;  %v4285_v52 = vld [vmem:[%s5720_s9 + $0x38] sm:$0xff]  ;;  %4781 = vmatprep.subr.bf16.mxu0 %v4780_v14 }
 0xd1d   :  { %v4776_v55 = vpack.c.bf16 %v4285_v52, %v4284_v16 }
 0xd1e   :  { %4681 = vmatmul.mubr.msk.f32.vlgmr.msra.gmra.mrb[44].mxu0 %vm575_vm7, %v3157_v46 }
 0xd1f   :  { %4777 = vmatprep.subr.bf16.mxu1 %v4776_v55  ;;  %4783 = vmatpush3.bf16.msra.mxu0 %v4780_v14  ;;  %v4311_v14 = vld [vmem:[%s5725_s14 + $0x1] ss:$0 sm:$0xff] }
 0xd20   :  { %4779 = vmatpush3.bf16.msra.mxu1 %v4776_v55  ;;  %4785 = vmatprep.subr.bf16.mxu0 %v4784_v18 }
 0xd21   :  { %4789 = vmatprep.subr.bf16.mxu1 %v4788_v22 }
 0xd23   :  { %4787 = vmatpush3.bf16.msra.mxu0 %v4784_v18 }
 0xd8b   :  { %v3306_v47 = vpop.f32.mrb[38].mxu0 }
 0xd8c   :  { %v4652_v48 = vpop.f32.mrb[39].mxu0 }
 0xd8f   :  { %v3230_v49 = vpop.f32.mrb[26].mxu1 }
 0xd90   :  { %v4647_v50 = vpop.f32.mrb[27].mxu1 }
 0xde4   :  { %v3382_v56 = vpop.f32.mrb[28].mxu1 }
 0xde5   :  { %v4657_v57 = vpop.f32.mrb[29].mxu1  ;;  %3768 = vrot.lane.b32.xlu0 %v3382_v56, %s4927_s4 }
 0xde8   :  { %v3534_v58 = vpop.f32.mrb[30].mxu1 }
 0xde9   :  { %v3458_v59 = vpop.f32.mrb[40].mxu0  ;;  %3776 = vrot.lane.b32.xlu0 %v3534_v58, %s4928_s25  ;;  %v4667_v60 = vpop.f32.mrb[31].mxu1 }
 0xdea   :  { %3770 = vrot.lane.b32.xlu1 %v3458_v59, %s4927_s4  ;;  %v4662_v61 = vpop.f32.mrb[41].mxu0 }
 0xdec   :  { %v3686_v62 = vpop.f32.mrb[32].mxu1 }
 0xded   :  { %v3610_v63 = vpop.f32.mrb[42].mxu0  ;;  %3784 = vrot.lane.b32.xlu0 %v3686_v62, %s4929_s3  ;;  %v4677_v0 = vpop.f32.mrb[33].mxu1 }
 0xdee   :  { %3778 = vrot.lane.b32.xlu1 %v3610_v63, %s4928_s25  ;;  %v4672_v2 = vpop.f32.mrb[43].mxu0  ;;  %v4292_v0 = vld [vmem:[%s5726_s15 + $0x1] ss:$0 sm:$0xff] }
 0xdf1   :  { %v3762_v25 = vpop.f32.mrb[44].mxu0 }
 0xdf2   :  { %3786 = vrot.lane.b32.xlu1 %v3762_v25, %s4929_s3  ;;  %v4682_v3 = vpop.f32.mrb[45].mxu0 }
 0xdf3   :  { %v4293_v3 = vld [vmem:[%s5727_s16 + $0x1] ss:$0 sm:$0xff] }
 0xe57   :  { %v3769_v1 = vpop.permute.xlu0 %3768 }
 0xe58   :  { %v3790_v32 = vsel %vm575_vm7, %v3230_v49, %v3769_v1 }
 0xe5b   :  { %v3777_v26 = vpop.permute.xlu0 %3776 }
 0xe5c   :  { %v3771_v4 = vpop.permute.xlu1 %3770  ;;  %v3792_v30 = vsel %vm1936_vm8, %v3790_v32, %v3777_v26 }
 0xe5d   :  { %v3791_v8 = vsel %vm575_vm7, %v3306_v47, %v3771_v4 }
 0xe5f   :  { %v3785_v5 = vpop.permute.xlu0 %3784 }
 0xe60   :  { %v3779_v6 = vpop.permute.xlu1 %3778  ;;  %v3794_v7 = vsel %vm1939_vm9, %v3792_v30, %v3785_v5  ;;  %v4308_v30 = vld [vmem:[%s5724_s13 + $0x70] sm:$0xff]  ;;  %v4309_v5 = vld [vmem:[%s5724_s13 + $0x78] sm:$0xff] }
 0xe61   :  { %4691 = vmatprep.mubr.msk.f32.mxu1 %vm477_vm6, %v3794_v7  ;;  %v3793_v9 = vsel %vm1936_vm8, %v3791_v8, %v3779_v6  ;;  %v4800_v6 = vpack.c.bf16 %v4309_v5, %v4308_v30  ;;  %v4299_v7 = vld [vmem:[%s5723_s12 + $0x1] ss:$0 sm:$0xff] }
 0xe64   :  { %v3787_v10 = vpop.permute.xlu1 %3786 }
 0xe65   :  { %v3795_v11 = vsel %vm1939_vm9, %v3793_v9, %v3787_v10 }
 0xe66   :  { %4692 = vmatmul.mubr.msk.f32.vlgmr.msra.gmra.mrb[34].mxu1 %vm477_vm6, %v3795_v11 }
 0xe67   :  { %4791 = vmatpush3.bf16.msra.mxu1 %v4788_v22 }
 0xe68   :  { %4793 = vmatprep.subr.bf16.mxu1 %v4792_v24 }
 0xe6b   :  { %4795 = vmatpush3.bf16.msra.mxu1 %v4792_v24 }
 0xe6c   :  { %4797 = vmatprep.subr.bf16.mxu1 %v4796_v29 }
 0xe6f   :  { %4799 = vmatpush3.bf16.msra.mxu1 %v4796_v29 }
 0xe70   :  { %4801 = vmatprep.subr.bf16.mxu1 %v4800_v6 }
 0xe73   :  { %4803 = vmatpush3.bf16.msra.mxu1 %v4800_v6 }
 0xf39   :  { %v4693_v33 = vpop.f32.mrb[34].mxu1 }
 0xf3a   :  { %v3887_v34 = vadd.f32 %v4693_v33, %v4287_v31  ;;  %v3881_v35 = vpop.f32.mrb[35].mxu1 }
 0xf3b   :  { %v3882_v36 = vadd.f32 %v4287_v31, %v3881_v35 }
 0xf3c   :  { %v3891_v37 = vadd.f32 %v3887_v34, %v5403_v15 }
 0xf3d   :  { %v3890_v38 = vadd.f32 %v3882_v36, %v5401_v43 }
 0xf3e   :  { %v3897_v39 = vsel %vm477_vm6, %v3891_v37, 0.0 }
 0xf3f   :  { %v3896_v40 = vsel %vm477_vm6, %v3890_v38, 0.0 }
 0xf40   :  { %v3898_v41 = vadd.f32 %v3897_v39, %v3896_v40 }
 0xf42   :  { %v3899_v44 = vrot.slane %v3898_v41, 4 }
 0xf44   :  { %v3900_v45 = vadd.f32 %v3899_v44, %v3898_v41 }
 0xf46   :  { %v3901_v46 = vrot.slane %v3900_v45, 2 }
 0xf48   :  { %v3902_v47 = vadd.f32 %v3901_v46, %v3900_v45 }
 0xf4a   :  { %v3903_v48 = vrot.slane %v3902_v47, 1 }
 0xf4c   :  { %v3904_v49 = vadd.f32 %v3903_v48, %v3902_v47 }
 0xf4e   :  { %v3905_v50 = vmul.f32 0.0625, %v3904_v49 }
 0xf50   :  { %v3906_v51 = vsub.f32 %v3890_v38, %v3905_v50  ;;  %v3907_v53 = vsub.f32 %v3891_v37, %v3905_v50 }
 0xf52   :  { %v3908_v54 = vmul.f32 %v3906_v51, %v3906_v51  ;;  %v3909_v16 = vmul.f32 %v3907_v53, %v3907_v53 }
 0xf54   :  { %v3910_v15 = vsel %vm477_vm6, %v3908_v54, 0.0  ;;  %v3911_v43 = vsel %vm477_vm6, %v3909_v16, 0.0  ;;  %v4316_v16 = vld [vmem:[%s5728_s17 + $0x1] ss:$0 sm:$0xff] }
 0xf55   :  { %v3912_v52 = vadd.f32 %v3911_v43, %v3910_v15 }
 0xf57   :  { %v3913_v55 = vrot.slane %v3912_v52, 4 }
 0xf59   :  { %v3914_v56 = vadd.f32 %v3913_v55, %v3912_v52  ;;  %v4317_v52 = vld [vmem:[%s5729_s18 + $0x1] ss:$0 sm:$0xff] }
 0xf5b   :  { %v3915_v57 = vrot.slane %v3914_v56, 2 }
 0xf5d   :  { %v3916_v58 = vadd.f32 %v3915_v57, %v3914_v56 }
 0xf5f   :  { %v3917_v59 = vrot.slane %v3916_v58, 1 }
 0xf61   :  { %v3918_v60 = vadd.f32 %v3917_v59, %v3916_v58 }
 0xf63   :  { %v3919_v61 = vmul.f32 0.0625, %v3918_v60 }
 0xf65   :  { %v3920_v62 = vadd.f32 1e-05, %v3919_v61 }
 0xf67   :  { %4891 = vrsqrt.f32 %v3920_v62 }
 0xf71   :  { %v4892_v63 = vpop.eup %4891 }
 0xf72   :  { %v3922_v2 = vmul.f32 %v4892_v63, %v3906_v51  ;;  %v3923_v25 = vmul.f32 %v4892_v63, %v3907_v53 }
 0xf74   :  { %v3930_v1 = vmul.f32 %v4292_v0, %v3922_v2  ;;  %v3931_v26 = vmul.f32 %v4292_v0, %v3923_v25 }
 0xf76   :  { %v3938_v4 = vadd.f32 %v4293_v3, %v3930_v1  ;;  %v3939_v32 = vadd.f32 %v4293_v3, %v3931_v26 }
 0xf78   :  { %4702 = vmatprep.mubr.msk.f32.mxu0 %vm477_vm6, %v3938_v4 }
 0xf79   :  { %4703 = vmatmul.mubr.msk.f32.vlgmr.msra.gmra.mrb[46].mxu0 %vm477_vm6, %v3939_v32 }
0x104c   :  { %v4704_v8 = vpop.f32.mrb[46].mxu0 }
0x104d   :  { %v4031_v9 = vadd.f32 %v4704_v8, %v4299_v7  ;;  %v4025_v10 = vpop.f32.mrb[47].mxu0 }
0x104e   :  { %v4026_v11 = vadd.f32 %v4299_v7, %v4025_v10 }
0x104f   :  { %v4035_v13 = vmax.f32 %v4031_v9, 0.0 }
0x1050   :  { %v4034_v12 = vmax.f32 %v4026_v11, 0.0 }
0x1052   :  { %4721 = vmatprep.mubr.msk.f32.mxu1 %vm2192_vm10, %v4034_v12 }
0x1053   :  { %4722 = vmatmul.mubr.msk.f32.vlgmr.msra.gmra.mrb[36].mxu1 %vm2192_vm10, %v4035_v13 }
0x1126   :  { %v4723_v17 = vpop.f32.mrb[36].mxu1 }
0x1127   :  { %v4131_v42 = vadd.f32 %v4723_v17, %v4311_v14  ;;  %v4125_v18 = vpop.f32.mrb[37].mxu1 }
0x1128   :  { %v4126_v19 = vadd.f32 %v4311_v14, %v4125_v18 }
0x1129   :  { %v4135_v20 = vadd.f32 %v4131_v42, %v3939_v32 }
0x112a   :  { %v4134_v21 = vadd.f32 %v4126_v19, %v3938_v4 }
0x112b   :  { %v4141_v22 = vsel %vm477_vm6, %v4135_v20, 0.0 }
0x112c   :  { %v4140_v23 = vsel %vm477_vm6, %v4134_v21, 0.0 }
0x112d   :  { %v4142_v24 = vadd.f32 %v4141_v22, %v4140_v23 }
0x112f   :  { %v4143_v27 = vrot.slane %v4142_v24, 4 }
0x1131   :  { %v4144_v28 = vadd.f32 %v4143_v27, %v4142_v24 }
0x1133   :  { %v4145_v29 = vrot.slane %v4144_v28, 2 }
0x1135   :  { %v4146_v31 = vadd.f32 %v4145_v29, %v4144_v28 }
0x1137   :  { %v4147_v33 = vrot.slane %v4146_v31, 1 }
0x1139   :  { %v4148_v34 = vadd.f32 %v4147_v33, %v4146_v31 }
0x113b   :  { %v4149_v35 = vmul.f32 0.0625, %v4148_v34 }
0x113d   :  { %v4150_v36 = vsub.f32 %v4134_v21, %v4149_v35  ;;  %v4151_v37 = vsub.f32 %v4135_v20, %v4149_v35 }
0x113f   :  { %v4152_v38 = vmul.f32 %v4150_v36, %v4150_v36  ;;  %v4153_v39 = vmul.f32 %v4151_v37, %v4151_v37 }
0x1141   :  { %v4154_v40 = vsel %vm477_vm6, %v4152_v38, 0.0  ;;  %v4155_v41 = vsel %vm477_vm6, %v4153_v39, 0.0 }
0x1142   :  { %v4156_v44 = vadd.f32 %v4155_v41, %v4154_v40 }
0x1144   :  { %v4157_v45 = vrot.slane %v4156_v44, 4 }
0x1146   :  { %v4158_v46 = vadd.f32 %v4157_v45, %v4156_v44 }
0x1148   :  { %v4159_v47 = vrot.slane %v4158_v46, 2 }
0x114a   :  { %v4160_v48 = vadd.f32 %v4159_v47, %v4158_v46 }
0x114c   :  { %v4161_v49 = vrot.slane %v4160_v48, 1 }
0x114e   :  { %v4162_v50 = vadd.f32 %v4161_v49, %v4160_v48 }
0x1150   :  { %v4163_v51 = vmul.f32 0.0625, %v4162_v50 }
0x1152   :  { %v4164_v53 = vadd.f32 1e-05, %v4163_v51 }
0x1154   :  { %4893 = vrsqrt.f32 %v4164_v53 }
0x115e   :  { %v4894_v54 = vpop.eup %4893 }
0x115f   :  { %v4166_v15 = vmul.f32 %v4894_v54, %v4150_v36  ;;  %v4167_v43 = vmul.f32 %v4894_v54, %v4151_v37 }
0x1161   :  { %v4174_v55 = vmul.f32 %v4316_v16, %v4166_v15  ;;  %v4175_v56 = vmul.f32 %v4316_v16, %v4167_v43 }
0x1163   :  { %v4182_v57 = vadd.f32 %v4317_v52, %v4174_v55  ;;  %v4183_v58 = vadd.f32 %v4317_v52, %v4175_v56 }
0x1165   :  { %4184 = vst.msk [vmem:[#allocation2] sm:$0xff] %vm477_vm6, %v4182_v57  ;;  %4185 = vst.msk [vmem:[#allocation2 + $0x8] sm:$0xff] %vm477_vm6, %v4183_v58 }
0x1166   :  { %4906 = shalt.err (!%p4903_p4)
}
0x1167   :  { %s4907_s5 = scalar_lea.hbm %s5730_s19, 256 }
0x1168   :  { %p4908_p5 = scmp.ne.s32.totalorder %s5730_s19, %s4907_s5  ;;  %p4911_p6 = scmp.lt.u32.totalorder %s4907_s5, %s5730_s19 }
0x116a   :  { %p4913_p7 = pnand %p4911_p6, %p4908_p5 }
0x116c   :  { %4916 = shalt.err (!%p4913_p7)
}
0x116d   :  { %s4931_s2 = smov 128  }
0x116e   :  { %4197 = dma.vmem_to_hbm [thread:$0]  %s4192_s8, 256, %s5730_s19, [#allocation3], %s4931_s2, %s4931_s2, %s4927_s4  }
0x116f   :  { %4917 = dma.done.wait [#allocation3], 256  }
0x1170   :  { %4918 = vsyncadd [#allocation3], 4294967040 }
0x1171   :  { %4201 = vsyncpa [#allocation3], 1 }

</bundles_post_ra>
